<compile_context>
chip_gen: v7x
topology: tpu7x:2x2x1
jax: 0.10.0
libtpu: 0.0.40
codegen_flags: <defaults>
</compile_context>

<pallas_src>
import functools

import jax
import jax.numpy as jnp
import numpy as np
from jax.experimental import pallas as pl
from jax.experimental.pallas import tpu as pltpu


def _s4block_epilogue_kernel(u_ref, x_ref, d_ref, w_ref, b_ref, o_ref):
    """Fused post-conv S4Block forward for one (batch, L-tile) grid step.

    u_ref : (1, H, TL) f32   causal SSM conv output (pre D-skip)
    x_ref : (1, H, TL) f32   original input tile
    d_ref : (H, 1)     f32   FFTConv skip parameter D
    w_ref : (2H, H)    bf16  output_linear weight (transposed, halves fused)
    b_ref : (2H, 1)    f32   output_linear bias
    o_ref : (1, H, TL) f32
    """
    H = d_ref.shape[0]
    # FFTConv: D skip connection + its internal GELU, then the block-level
    # GELU.  tanh-approximate GELU routes the transcendental to the EUP slot
    # (free under the MXU) instead of a long erf polynomial on the VALU.
    y = u_ref[0] + d_ref[...] * x_ref[0]                     # (H, TL) f32
    y = jax.nn.gelu(y, approximate=True)                     # FFTConv act
    y = jax.nn.gelu(y, approximate=True)                     # block act

    # output_linear = Linear(H, 2H) + GLU as ONE (2H,H)x(H,TL) MXU matmul
    # (bf16 in, f32 accumulate) with the bias folded in.  The GLU split is a
    # static sublane slice at H (H is a multiple of 8), and the gated product
    # is written straight into o_ref to minimize live whole-tile temporaries.
    z = jnp.dot(w_ref[...], y.astype(jnp.bfloat16),
                preferred_element_type=jnp.float32) + b_ref[...]   # (2H, TL)
    o_ref[0] = (z[:H, :] * jax.nn.sigmoid(z[H:, :])).astype(o_ref.dtype)


def s4d_conv_kernel(log_dt, C, L, chunk=2048):
    """Materialize the S4D (diagonal SSM) conv kernel. Returns (H, L) f32.

    Chunked over L so the complex Vandermonde tensor stays (H, N/2, chunk)
    instead of (H, N/2, L) (avoids multi-GiB temporaries at long L).
    """
    H, N2 = C.shape
    A = -0.5 + 1j * jnp.pi * jnp.arange(N2, dtype=jnp.float32)       # S4D-Lin
    A = jnp.broadcast_to(A, (H, N2))
    dt = jnp.exp(log_dt)[:, None]                                    # (H, 1)
    dtA = dt * A                                                     # (H, N2)
    C_disc = C * (jnp.exp(dtA) - 1.0) / A                            # ZOH, B=1
    pieces = []
    for start in range(0, L, chunk):
        ls = jnp.arange(start, min(start + chunk, L), dtype=jnp.float32)
        vand = jnp.exp(dtA[:, :, None] * ls)                         # (H,N2,c)
        pieces.append(2.0 * jnp.real(jnp.einsum('hn,hnl->hl', C_disc, vand)))
    return jnp.concatenate(pieces, axis=-1).astype(jnp.float32)      # (H, L)


def _chip_budget():
    """Return (max L-tile, scoped VMEM limit bytes) per TPU generation."""
    try:
        kind = jax.devices()[0].device_kind.lower()
    except Exception:
        kind = ""
    if "v7" in kind:
        return 512, 40 * 1024 * 1024          # 64 MiB physical VMEM on v7x
    if "v4" in kind or "v5" in kind or "v6" in kind:
        return 2048, 96 * 1024 * 1024         # 128 MiB physical VMEM
    return 1024, 48 * 1024 * 1024             # unknown: conservative


def _pick_seq_tile(Lp, H, vmem_bytes, cap):
    """Largest 128-multiple tile dividing Lp whose footprint fits the budget."""
    candidates = [c for c in (2048, 1024, 512, 256, 128)
                  if c <= cap and Lp % c == 0]
    for cand in candidates:
        # 6 double-buffered f32 tile streams (u, x, out) + ~3 whole-tile f32
        # temporaries (y and the (2H,TL) matmul result) + weights/bias.
        footprint = (6 + 3) * H * cand * 4 + 8 * H * H + 32 * H
        if footprint <= vmem_bytes:
            return cand
    return candidates[-1] if candidates else min(Lp, 128)


def _const_spec(shape, single_buffer):
    """BlockSpec for a grid-invariant operand; single-buffered if supported."""
    index_map = lambda b_, l_: (0,) * len(shape)
    if single_buffer:
        try:
            return pl.BlockSpec(shape, index_map, pipeline_mode=pl.Buffered(1))
        except Exception:
            pass
    return pl.BlockSpec(shape, index_map)


def s4block_forward(x_bhl, params, tile_l=None, single_buffer_consts=True):
    """x_bhl: (B, H, L) float32. Returns (y: (B, H, L), state=None)."""
    B, H, L = x_bhl.shape
    x = x_bhl.astype(jnp.float32)

    # ---- SSM kernel + FFT causal convolution (XLA; same path as torch.fft) --
    # TODO(synk): no Pallas FFT primitive; the long convolution stays in XLA.
    k = s4d_conv_kernel(params['log_dt'], params['C'], L)            # (H, L)
    n = 2 * L                                                        # l_kernel + L
    kf = jnp.fft.rfft(k, n=n, axis=-1)                               # (H, n/2+1)
    xf = jnp.fft.rfft(x, n=n, axis=-1)                               # (B, H, n/2+1)
    # No [..., :L] slice: that would materialize an extra (B,H,L) f32 HBM
    # copy.  The u BlockSpec below only addresses the first L//tl blocks.
    u_full = jnp.fft.irfft(xf * kf[None], n=n, axis=-1)              # (B, H, 2L)

    # ---- weight prep: fused (2H, H) projection, bf16 operands for the MXU ---
    d = params['D'].reshape(H, 1).astype(jnp.float32)
    w = jnp.transpose(params['W'].astype(jnp.float32)).astype(jnp.bfloat16)  # (2H, H)
    b = params['b'].astype(jnp.float32).reshape(2 * H, 1)

    # ---- tiling / VMEM budget per chip generation ---------------------------
    tl_cap, vmem_limit = _chip_budget()
    Lp = ((L + 127) // 128) * 128
    if tile_l is not None and Lp % tile_l == 0:
        tl = tile_l
    else:
        tl = _pick_seq_tile(Lp, H, vmem_limit, tl_cap)
    # Keep >= 2 grid steps so both v7x TensorCores get work.
    while (B * (Lp // tl) < 2 and tl > 128
           and (tl // 2) % 128 == 0 and Lp % (tl // 2) == 0):
        tl //= 2

    if Lp == L:
        u_in, x_in = u_full, x
    else:
        # TODO(synk): ragged L — pad to a multiple of 128 instead of building
        # one huge (1,H,L) tile; padded tail is sliced off below.
        pad = Lp - L
        u_in = jnp.pad(u_full[..., :L], ((0, 0), (0, 0), (0, pad)))
        x_in = jnp.pad(x, ((0, 0), (0, 0), (0, pad)))

    grid = (B, Lp // tl)

    cost = pl.CostEstimate(
        flops=int(4 * B * Lp * H * H + 10 * B * H * Lp),
        transcendentals=int(3 * B * H * Lp),
        bytes_accessed=int(4 * 3 * B * H * Lp + 2 * 2 * H * H + 4 * 5 * H),
    )

    out = pl.pallas_call(
        _s4block_epilogue_kernel,
        out_shape=jax.ShapeDtypeStruct((B, H, Lp), jnp.float32),
        grid=grid,
        in_specs=[
            pl.BlockSpec((1, H, tl), lambda b_, l_: (b_, 0, l_)),    # u (conv out)
            pl.BlockSpec((1, H, tl), lambda b_, l_: (b_, 0, l_)),    # x
            _const_spec((H, 1), single_buffer_consts),               # D
            _const_spec((2 * H, H), single_buffer_consts),           # W^T (bf16)
            _const_spec((2 * H, 1), single_buffer_consts),           # bias
        ],
        out_specs=pl.BlockSpec((1, H, tl), lambda b_, l_: (b_, 0, l_)),
        compiler_params=pltpu.CompilerParams(
            dimension_semantics=("parallel", "parallel"),
            vmem_limit_bytes=vmem_limit),
        cost_estimate=cost,
    )(u_in, x_in, d, w, b)

    if Lp != L:
        out = out[..., :L]
    return out, None


def s4block_reference(x_bhl, params):
    """Pure-JAX (f32, exact-erf GELU) reference mirroring the PyTorch forward."""
    B, H, L = x_bhl.shape
    x = jnp.transpose(x_bhl, (0, 2, 1)).astype(jnp.float32)          # (B, L, H)
    k = s4d_conv_kernel(params['log_dt'], params['C'], L)            # (H, L)
    n = 2 * L
    kf = jnp.fft.rfft(k, n=n, axis=-1)                               # (H, n/2+1)
    xf = jnp.fft.rfft(x, n=n, axis=1)                                # (B, n/2+1, H)
    y = jnp.fft.irfft(xf * kf.T[None], n=n, axis=1)[:, :L, :]
    y = y + x * params['D'][None, None, :]
    y = jax.nn.gelu(y, approximate=False)                            # FFTConv act
    y = jax.nn.gelu(y, approximate=False)                            # block act
    z = jnp.einsum('blh,hk->blk', y, params['W'],
                   precision=jax.lax.Precision.HIGHEST) + params['b'][None, None, :]
    y = z[..., :H] * jax.nn.sigmoid(z[..., H:])
    return jnp.transpose(y, (0, 2, 1)), None


if __name__ == "__main__":
    B, H, L, N = 2, 32, 256, 16       # batch, d_model, seq len, SSM state size
    N2 = N // 2

    key = jax.random.PRNGKey(0)
    k1, k2, k3, k4, k5, k6, k7 = jax.random.split(key, 7)

    x = jax.random.normal(k1, (B, H, L), jnp.float32)                # (B, H, L)

    params = {
        # SSM kernel (S4D) parameters
        'log_dt': jnp.log(0.001) + jax.random.uniform(k2, (H,), jnp.float32)
                  * (jnp.log(0.1) - jnp.log(0.001)),
        'C': ((jax.random.normal(k3, (H, N2), jnp.float32)
               + 1j * jax.random.normal(k4, (H, N2), jnp.float32))
              * jnp.float32(0.5 ** 0.5)),
        # FFTConv skip parameter D (channels=1)
        'D': jax.random.normal(k5, (H,), jnp.float32),
        # output_linear: Linear(H, 2H) (GLU doubles the output dim) + bias
        'W': jax.random.normal(k6, (H, 2 * H), jnp.float32) / jnp.sqrt(H),
        'b': 0.01 * jax.random.normal(k7, (2 * H,), jnp.float32),
    }

    def run(single_buffer_consts):
        fwd = jax.jit(functools.partial(
            s4block_forward, single_buffer_consts=single_buffer_consts))
        y, st = fwd(x, params)
        return jax.block_until_ready(y), st

    try:
        y, state = run(True)
    except Exception:
        # Fallback if pl.Buffered(1) single-buffering of the constant operands
        # is rejected by this jax/libtpu; identical math, default buffering.
        y, state = run(False)

    assert y.shape == x.shape and state is None

    y_ref, _ = s4block_reference(x, params)
    # Tolerance accounts for the tanh-approximate GELU and bf16-in / f32-acc
    # MXU projection in the kernel vs. the erf-GELU / f32-HIGHEST reference.
    np.testing.assert_allclose(np.asarray(y), np.asarray(y_ref),
                               rtol=3e-2, atol=3e-2)

    print("KERNEL_OK")
</pallas_src>

<mosaic_0001>
module attributes {stable_mosaic.version = 11 : i64} {
  func.func @_s4block_epilogue_kernel(%arg0: i32, %arg1: i32, %arg2: memref<1x32x256xf32, #tpu.memory_space<vmem>>, %arg3: memref<1x32x256xf32, #tpu.memory_space<vmem>>, %arg4: memref<32x1xf32, #tpu.memory_space<vmem>>, %arg5: memref<64x32xbf16, #tpu.memory_space<vmem>>, %arg6: memref<64x1xf32, #tpu.memory_space<vmem>>, %arg7: memref<1x32x256xf32, #tpu.memory_space<vmem>>) attributes {dimension_semantics = [#tpu.dimension_semantics<parallel>, #tpu.dimension_semantics<parallel>], iteration_bounds = array<i64: 2, 1>, scalar_prefetch = 0 : i64, scratch_operands = 0 : i64, tpu.core_type = #tpu.core_type<tc>, window_params = [{transform_indices = @transform_0, window_bounds = array<i64: 1, 32, 256>}, {transform_indices = @transform_1, window_bounds = array<i64: 1, 32, 256>}, {pipeline_mode = #tpu.pipeline_mode<synchronous>, transform_indices = @transform_2, window_bounds = array<i64: 32, 1>}, {pipeline_mode = #tpu.pipeline_mode<synchronous>, transform_indices = @transform_3, window_bounds = array<i64: 64, 32>}, {pipeline_mode = #tpu.pipeline_mode<synchronous>, transform_indices = @transform_4, window_bounds = array<i64: 64, 1>}, {transform_indices = @transform_5, window_bounds = array<i64: 1, 32, 256>}]} {
    %c0 = arith.constant 0 : index
    %c0_0 = arith.constant 0 : index
    %c0_1 = arith.constant 0 : index
    %0 = vector.load %arg2[%c0, %c0_0, %c0_1] : memref<1x32x256xf32, #tpu.memory_space<vmem>>, vector<1x32x256xf32>
    %1 = vector.shape_cast %0 : vector<1x32x256xf32> to vector<32x256xf32>
    %c0_2 = arith.constant 0 : index
    %c0_3 = arith.constant 0 : index
    %2 = vector.load %arg4[%c0_2, %c0_3] : memref<32x1xf32, #tpu.memory_space<vmem>>, vector<32x1xf32>
    %c0_4 = arith.constant 0 : index
    %c0_5 = arith.constant 0 : index
    %c0_6 = arith.constant 0 : index
    %3 = vector.load %arg3[%c0_4, %c0_5, %c0_6] : memref<1x32x256xf32, #tpu.memory_space<vmem>>, vector<1x32x256xf32>
    %4 = vector.shape_cast %3 : vector<1x32x256xf32> to vector<32x256xf32>
    %5 = vector.broadcast %2 : vector<32x1xf32> to vector<32x256xf32>
    %6 = arith.mulf %5, %4 : vector<32x256xf32>
    %7 = arith.addf %1, %6 : vector<32x256xf32>
    %8 = arith.mulf %7, %7 : vector<32x256xf32>
    %9 = arith.mulf %7, %8 : vector<32x256xf32>
    %cst = arith.constant 4.471500e-02 : f32
    %10 = vector.broadcast %cst : f32 to vector<32x256xf32>
    %11 = arith.mulf %10, %9 : vector<32x256xf32>
    %12 = arith.addf %7, %11 : vector<32x256xf32>
    %cst_7 = arith.constant 0.797884583 : f32
    %13 = vector.broadcast %cst_7 : f32 to vector<32x256xf32>
    %14 = arith.mulf %13, %12 : vector<32x256xf32>
    %15 = math.tanh %14 : vector<32x256xf32>
    %cst_8 = arith.constant 1.000000e+00 : f32
    %16 = vector.broadcast %cst_8 : f32 to vector<32x256xf32>
    %17 = arith.addf %16, %15 : vector<32x256xf32>
    %cst_9 = arith.constant 5.000000e-01 : f32
    %18 = vector.broadcast %cst_9 : f32 to vector<32x256xf32>
    %19 = arith.mulf %18, %17 : vector<32x256xf32>
    %20 = arith.mulf %7, %19 : vector<32x256xf32>
    %21 = arith.mulf %20, %20 : vector<32x256xf32>
    %22 = arith.mulf %20, %21 : vector<32x256xf32>
    %cst_10 = arith.constant 4.471500e-02 : f32
    %23 = vector.broadcast %cst_10 : f32 to vector<32x256xf32>
    %24 = arith.mulf %23, %22 : vector<32x256xf32>
    %25 = arith.addf %20, %24 : vector<32x256xf32>
    %cst_11 = arith.constant 0.797884583 : f32
    %26 = vector.broadcast %cst_11 : f32 to vector<32x256xf32>
    %27 = arith.mulf %26, %25 : vector<32x256xf32>
    %28 = math.tanh %27 : vector<32x256xf32>
    %cst_12 = arith.constant 1.000000e+00 : f32
    %29 = vector.broadcast %cst_12 : f32 to vector<32x256xf32>
    %30 = arith.addf %29, %28 : vector<32x256xf32>
    %cst_13 = arith.constant 5.000000e-01 : f32
    %31 = vector.broadcast %cst_13 : f32 to vector<32x256xf32>
    %32 = arith.mulf %31, %30 : vector<32x256xf32>
    %33 = arith.mulf %20, %32 : vector<32x256xf32>
    %c0_14 = arith.constant 0 : index
    %c0_15 = arith.constant 0 : index
    %34 = vector.load %arg5[%c0_14, %c0_15] : memref<64x32xbf16, #tpu.memory_space<vmem>>, vector<64x32xbf16>
    %35 = arith.truncf %33 : vector<32x256xf32> to vector<32x256xbf16>
    %cst_16 = arith.constant dense<0.000000e+00> : vector<64x256xf32>
    %36 = tpu.matmul %34, %35, %cst_16 {dimension_numbers = #tpu.dot_dimension_numbers<[1], [0], [0], [1], [0, 0, 1, 1], [], []>} : vector<64x32xbf16>, vector<32x256xbf16>, vector<64x256xf32> -> vector<64x256xf32>
    %c0_17 = arith.constant 0 : index
    %c0_18 = arith.constant 0 : index
    %37 = vector.load %arg6[%c0_17, %c0_18] : memref<64x1xf32, #tpu.memory_space<vmem>>, vector<64x1xf32>
    %38 = vector.broadcast %37 : vector<64x1xf32> to vector<64x256xf32>
    %39 = arith.addf %36, %38 : vector<64x256xf32>
    %40 = vector.extract_strided_slice %39 {offsets = [0, 0], sizes = [32, 256], strides = [1, 1]} : vector<64x256xf32> to vector<32x256xf32>
    %41 = vector.extract_strided_slice %39 {offsets = [32, 0], sizes = [32, 256], strides = [1, 1]} : vector<64x256xf32> to vector<32x256xf32>
    %42 = arith.negf %41 : vector<32x256xf32>
    %43 = math.exp %42 : vector<32x256xf32>
    %cst_19 = arith.constant 1.000000e+00 : f32
    %44 = vector.broadcast %cst_19 : f32 to vector<32x256xf32>
    %45 = arith.addf %44, %43 : vector<32x256xf32>
    %46 = arith.divf %44, %45 : vector<32x256xf32>
    %47 = arith.mulf %40, %46 : vector<32x256xf32>
    %c0_20 = arith.constant 0 : index
    %c0_21 = arith.constant 0 : index
    %c0_22 = arith.constant 0 : index
    %48 = vector.load %arg7[%c0_20, %c0_21, %c0_22] : memref<1x32x256xf32, #tpu.memory_space<vmem>>, vector<1x32x256xf32>
    %49 = vector.shape_cast %48 : vector<1x32x256xf32> to vector<32x256xf32>
    %50 = vector.shape_cast %47 : vector<32x256xf32> to vector<1x32x256xf32>
    tpu.vector_store %arg7[%c0_20, %c0_21, %c0_22], %50 {strides = array<i32>} : memref<1x32x256xf32, #tpu.memory_space<vmem>>, vector<1x32x256xf32>,
    return
  }
  func.func @transform_0(%arg0: i32, %arg1: i32) -> (i32, i32, i32) {
    %c0_i32 = arith.constant 0 : i32
    %c0_i32_0 = arith.constant 0 : i32
    return %arg0, %c0_i32, %arg1 : i32, i32, i32
  }
  func.func @transform_1(%arg0: i32, %arg1: i32) -> (i32, i32, i32) {
    %c0_i32 = arith.constant 0 : i32
    %c0_i32_0 = arith.constant 0 : i32
    return %arg0, %c0_i32, %arg1 : i32, i32, i32
  }
  func.func @transform_2(%arg0: i32, %arg1: i32) -> (i32, i32) {
    %c0_i32 = arith.constant 0 : i32
    %c0_i32_0 = arith.constant 0 : i32
    %c0_i32_1 = arith.constant 0 : i32
    return %c0_i32, %c0_i32_0 : i32, i32
  }
  func.func @transform_3(%arg0: i32, %arg1: i32) -> (i32, i32) {
    %c0_i32 = arith.constant 0 : i32
    %c0_i32_0 = arith.constant 0 : i32
    %c0_i32_1 = arith.constant 0 : i32
    return %c0_i32, %c0_i32_0 : i32, i32
  }
  func.func @transform_4(%arg0: i32, %arg1: i32) -> (i32, i32) {
    %c0_i32 = arith.constant 0 : i32
    %c0_i32_0 = arith.constant 0 : i32
    %c0_i32_1 = arith.constant 0 : i32
    return %c0_i32, %c0_i32_0 : i32, i32
  }
  func.func @transform_5(%arg0: i32, %arg1: i32) -> (i32, i32, i32) {
    %c0_i32 = arith.constant 0 : i32
    %c0_i32_0 = arith.constant 0 : i32
    return %arg0, %c0_i32, %arg1 : i32, i32, i32
  }
}

module attributes {stable_mosaic.version = 11 : i64} {
  func.func @_s4block_epilogue_kernel(%arg0: i32, %arg1: i32, %arg2: memref<1x32x256xf32, #tpu.memory_space<vmem>>, %arg3: memref<1x32x256xf32, #tpu.memory_space<vmem>>, %arg4: memref<32x1xf32, #tpu.memory_space<vmem>>, %arg5: memref<64x32xbf16, #tpu.memory_space<vmem>>, %arg6: memref<64x1xf32, #tpu.memory_space<vmem>>, %arg7: memref<1x32x256xf32, #tpu.memory_space<vmem>>) attributes {dimension_semantics = [#tpu.dimension_semantics<parallel>, #tpu.dimension_semantics<parallel>], iteration_bounds = array<i64: 2, 1>, scalar_prefetch = 0 : i64, scratch_operands = 0 : i64, tpu.core_type = #tpu.core_type<tc>, window_params = [{transform_indices = @transform_0, window_bounds = array<i64: 1, 32, 256>}, {transform_indices = @transform_1, window_bounds = array<i64: 1, 32, 256>}, {pipeline_mode = #tpu.pipeline_mode<synchronous>, transform_indices = @transform_2, window_bounds = array<i64: 32, 1>}, {pipeline_mode = #tpu.pipeline_mode<synchronous>, transform_indices = @transform_3, window_bounds = array<i64: 64, 32>}, {pipeline_mode = #tpu.pipeline_mode<synchronous>, transform_indices = @transform_4, window_bounds = array<i64: 64, 1>}, {transform_indices = @transform_5, window_bounds = array<i64: 1, 32, 256>}]} {
    %c0 = arith.constant 0 : index
    %c0_0 = arith.constant 0 : index
    %c0_1 = arith.constant 0 : index
    %0 = vector.load %arg2[%c0, %c0_0, %c0_1] : memref<1x32x256xf32, #tpu.memory_space<vmem>>, vector<1x32x256xf32>
    %1 = vector.shape_cast %0 : vector<1x32x256xf32> to vector<32x256xf32>
    %c0_2 = arith.constant 0 : index
    %c0_3 = arith.constant 0 : index
    %2 = vector.load %arg4[%c0_2, %c0_3] : memref<32x1xf32, #tpu.memory_space<vmem>>, vector<32x1xf32>
    %c0_4 = arith.constant 0 : index
    %c0_5 = arith.constant 0 : index
    %c0_6 = arith.constant 0 : index
    %3 = vector.load %arg3[%c0_4, %c0_5, %c0_6] : memref<1x32x256xf32, #tpu.memory_space<vmem>>, vector<1x32x256xf32>
    %4 = vector.shape_cast %3 : vector<1x32x256xf32> to vector<32x256xf32>
    %5 = vector.broadcast %2 : vector<32x1xf32> to vector<32x256xf32>
    %6 = arith.mulf %5, %4 : vector<32x256xf32>
    %7 = arith.addf %1, %6 : vector<32x256xf32>
    %8 = arith.mulf %7, %7 : vector<32x256xf32>
    %9 = arith.mulf %7, %8 : vector<32x256xf32>
    %cst = arith.constant 4.471500e-02 : f32
    %10 = vector.broadcast %cst : f32 to vector<32x256xf32>
    %11 = arith.mulf %10, %9 : vector<32x256xf32>
    %12 = arith.addf %7, %11 : vector<32x256xf32>
    %cst_7 = arith.constant 0.797884583 : f32
    %13 = vector.broadcast %cst_7 : f32 to vector<32x256xf32>
    %14 = arith.mulf %13, %12 : vector<32x256xf32>
    %15 = math.tanh %14 : vector<32x256xf32>
    %cst_8 = arith.constant 1.000000e+00 : f32
    %16 = vector.broadcast %cst_8 : f32 to vector<32x256xf32>
    %17 = arith.addf %16, %15 : vector<32x256xf32>
    %cst_9 = arith.constant 5.000000e-01 : f32
    %18 = vector.broadcast %cst_9 : f32 to vector<32x256xf32>
    %19 = arith.mulf %18, %17 : vector<32x256xf32>
    %20 = arith.mulf %7, %19 : vector<32x256xf32>
    %21 = arith.mulf %20, %20 : vector<32x256xf32>
    %22 = arith.mulf %20, %21 : vector<32x256xf32>
    %cst_10 = arith.constant 4.471500e-02 : f32
    %23 = vector.broadcast %cst_10 : f32 to vector<32x256xf32>
    %24 = arith.mulf %23, %22 : vector<32x256xf32>
    %25 = arith.addf %20, %24 : vector<32x256xf32>
    %cst_11 = arith.constant 0.797884583 : f32
    %26 = vector.broadcast %cst_11 : f32 to vector<32x256xf32>
    %27 = arith.mulf %26, %25 : vector<32x256xf32>
    %28 = math.tanh %27 : vector<32x256xf32>
    %cst_12 = arith.constant 1.000000e+00 : f32
    %29 = vector.broadcast %cst_12 : f32 to vector<32x256xf32>
    %30 = arith.addf %29, %28 : vector<32x256xf32>
    %cst_13 = arith.constant 5.000000e-01 : f32
    %31 = vector.broadcast %cst_13 : f32 to vector<32x256xf32>
    %32 = arith.mulf %31, %30 : vector<32x256xf32>
    %33 = arith.mulf %20, %32 : vector<32x256xf32>
    %c0_14 = arith.constant 0 : index
    %c0_15 = arith.constant 0 : index
    %34 = vector.load %arg5[%c0_14, %c0_15] : memref<64x32xbf16, #tpu.memory_space<vmem>>, vector<64x32xbf16>
    %35 = arith.truncf %33 : vector<32x256xf32> to vector<32x256xbf16>
    %cst_16 = arith.constant dense<0.000000e+00> : vector<64x256xf32>
    %36 = tpu.matmul %34, %35, %cst_16 {dimension_numbers = #tpu.dot_dimension_numbers<[1], [0], [0], [1], [0, 0, 1, 1], [], []>} : vector<64x32xbf16>, vector<32x256xbf16>, vector<64x256xf32> -> vector<64x256xf32>
    %c0_17 = arith.constant 0 : index
    %c0_18 = arith.constant 0 : index
    %37 = vector.load %arg6[%c0_17, %c0_18] : memref<64x1xf32, #tpu.memory_space<vmem>>, vector<64x1xf32>
    %38 = vector.broadcast %37 : vector<64x1xf32> to vector<64x256xf32>
    %39 = arith.addf %36, %38 : vector<64x256xf32>
    %40 = vector.extract_strided_slice %39 {offsets = [0, 0], sizes = [32, 256], strides = [1, 1]} : vector<64x256xf32> to vector<32x256xf32>
    %41 = vector.extract_strided_slice %39 {offsets = [32, 0], sizes = [32, 256], strides = [1, 1]} : vector<64x256xf32> to vector<32x256xf32>
    %42 = arith.negf %41 : vector<32x256xf32>
    %43 = math.exp %42 : vector<32x256xf32>
    %cst_19 = arith.constant 1.000000e+00 : f32
    %44 = vector.broadcast %cst_19 : f32 to vector<32x256xf32>
    %45 = arith.addf %44, %43 : vector<32x256xf32>
    %46 = arith.divf %44, %45 : vector<32x256xf32>
    %47 = arith.mulf %40, %46 : vector<32x256xf32>
    %c0_20 = arith.constant 0 : index
    %c0_21 = arith.constant 0 : index
    %c0_22 = arith.constant 0 : index
    %48 = vector.load %arg7[%c0_20, %c0_21, %c0_22] : memref<1x32x256xf32, #tpu.memory_space<vmem>>, vector<1x32x256xf32>
    %49 = vector.shape_cast %48 : vector<1x32x256xf32> to vector<32x256xf32>
    %50 = vector.shape_cast %47 : vector<32x256xf32> to vector<1x32x256xf32>
    tpu.vector_store %arg7[%c0_20, %c0_21, %c0_22], %50 {strides = array<i32>} : memref<1x32x256xf32, #tpu.memory_space<vmem>>, vector<1x32x256xf32>,
    return
  }
  func.func @transform_0(%arg0: i32, %arg1: i32) -> (i32, i32, i32) {
    %c0_i32 = arith.constant 0 : i32
    %c0_i32_0 = arith.constant 0 : i32
    return %arg0, %c0_i32, %arg1 : i32, i32, i32
  }
  func.func @transform_1(%arg0: i32, %arg1: i32) -> (i32, i32, i32) {
    %c0_i32 = arith.constant 0 : i32
    %c0_i32_0 = arith.constant 0 : i32
    return %arg0, %c0_i32, %arg1 : i32, i32, i32
  }
  func.func @transform_2(%arg0: i32, %arg1: i32) -> (i32, i32) {
    %c0_i32 = arith.constant 0 : i32
    %c0_i32_0 = arith.constant 0 : i32
    %c0_i32_1 = arith.constant 0 : i32
    return %c0_i32, %c0_i32_0 : i32, i32
  }
  func.func @transform_3(%arg0: i32, %arg1: i32) -> (i32, i32) {
    %c0_i32 = arith.constant 0 : i32
    %c0_i32_0 = arith.constant 0 : i32
    %c0_i32_1 = arith.constant 0 : i32
    return %c0_i32, %c0_i32_0 : i32, i32
  }
  func.func @transform_4(%arg0: i32, %arg1: i32) -> (i32, i32) {
    %c0_i32 = arith.constant 0 : i32
    %c0_i32_0 = arith.constant 0 : i32
    %c0_i32_1 = arith.constant 0 : i32
    return %c0_i32, %c0_i32_0 : i32, i32
  }
  func.func @transform_5(%arg0: i32, %arg1: i32) -> (i32, i32, i32) {
    %c0_i32 = arith.constant 0 : i32
    %c0_i32_0 = arith.constant 0 : i32
    return %arg0, %c0_i32, %arg1 : i32, i32, i32
  }
}

</mosaic_0001>

<bundles_post_ra>
// kernel: custom-call
= control target key start
LH: loop header
LB: loop body
LE: loop exit
PB: predicated region body
PF: predicated region fallthrough
CT: control target
= control target key end

     0   :  { %2 = vsyncpa [#allocation0], 0  ;;  %s61_s0 = inlined_call_operand.hbm [shape: c64[32,8], index: 0, kind: input, shape index: {}]   ;;  %s62_s1 = inlined_call_operand.vmem [shape: f32[32,8], index: 1, kind: output, shape index: {}]  }
   0x1   :  { %s3_s8 = sshll.u32 %s62_s1, 4  ;;  %s9_s11 = scalar_lea.hbm %s61_s0, 128  ;;  %s4_s8 = int_to_ptr.vmem [resolvable:$true] %s3_s8 }
   0x2   :  { %p10_p0 = scmp.ne.s32.totalorder %s61_s0, %s9_s11  ;;  %s11_s16 = scalar_lea.hbm %s61_s0, 256 }
   0x3   :  { %p12_p1 = scmp.lt.u32.totalorder %s11_s16, %s9_s11  ;;  %p13_p2 = scmp.lt.u32.totalorder %s9_s11, %s61_s0 }
   0x5   :  { %p14_p3 = por %p13_p2, %p12_p1 }
   0x7   :  { %p15_p4 = pnand %p14_p3, %p10_p0 }
   0x9   :  { %18 = shalt.err (!%p15_p4)  }
   0xa   :  { %s19_s1 = scalar_lea.vmem %s4_s8, 128  ;;  %p24_p6 = scmp.lt.s32.totalorder %s4_s8, %s4_s8 }
   0xb   :  { %p20_p5 = scmp.ne.s32.totalorder %s4_s8, %s19_s1  ;;  %p25_p7 = scmp.lt.s32.totalorder %s19_s1, %s19_s1 }
   0xd   :  { %p26_p8 = por %p25_p7, %p24_p6 }
   0xf   :  { %p27_p9 = pnand %p26_p8, %p20_p5 }
  0x11   :  { %30 = shalt.err (!%p27_p9)  }
  0x12   :  { %6 = dma.hbm_to_vmem [thread:$0]  %s61_s0, 128, %s4_s8, [#allocation0] }
  0x13   :  { %31 = dma.done.wait [#allocation0], 128  }
  0x14   :  { %32 = vsyncadd [#allocation0], 4294967168 }
  0x15   :  { %8 = vsyncpa [#allocation0], 1 }

// kernel: custom-call.1
= control target key start
LH: loop header
LB: loop body
LE: loop exit
PB: predicated region body
PF: predicated region fallthrough
CT: control target
= control target key end

     0   :  { %s59_s0 = inlined_call_operand.hbm [shape: c64[32,8], index: 0, kind: input, shape index: {}]   ;;  %s60_s1 = inlined_call_operand.vmem [shape: f32[32,8], index: 1, kind: output, shape index: {}]  }
   0x1   :  { %s2_s8 = scalar_lea.hbm %s59_s0, 128 }
   0x2   :  { %3 = vsyncpa [#allocation0], 0  ;;  %s4_s11 = sshll.u32 %s60_s1, 4  ;;  %s34_s14 = scalar_lea.hbm %s59_s0, 256  ;;  %s5_s11 = int_to_ptr.vmem [resolvable:$true] %s4_s11 }
   0x3   :  { %p11_p0 = scmp.ne.s32.totalorder %s2_s8, %s34_s14  ;;  %p13_p1 = scmp.lt.u32.totalorder %s2_s8, %s59_s0 }
   0x4   :  { %p14_p2 = scmp.lt.u32.totalorder %s34_s14, %s34_s14  ;;  %p16_p4 = scmp.lt.u32.totalorder %s34_s14, %s2_s8 }
   0x6   :  { %p15_p3 = por %p14_p2, %p13_p1 }
   0x8   :  { %p17_p5 = por %p16_p4, %p15_p3 }
   0xa   :  { %p18_p6 = pnand %p17_p5, %p11_p0 }
   0xc   :  { %21 = shalt.err (!%p18_p6)  }
   0xd   :  { %s22_s17 = scalar_lea.vmem %s5_s11, 128  ;;  %p27_p8 = scmp.lt.s32.totalorder %s5_s11, %s5_s11 }
   0xe   :  { %p23_p7 = scmp.ne.s32.totalorder %s5_s11, %s22_s17  ;;  %p28_p9 = scmp.lt.s32.totalorder %s22_s17, %s22_s17 }
  0x10   :  { %p29_p10 = por %p28_p9, %p27_p8 }
  0x12   :  { %p30_p11 = pnand %p29_p10, %p23_p7 }
  0x14   :  { %33 = shalt.err (!%p30_p11)  }
  0x15   :  { %7 = dma.hbm_to_vmem [thread:$0]  %s2_s8, 128, %s5_s11, [#allocation0] }
  0x16   :  { %35 = dma.done.wait [#allocation0], 128  }
  0x17   :  { %36 = vsyncadd [#allocation0], 4294967168 }
  0x18   :  { %9 = vsyncpa [#allocation0], 1 }

// kernel: reverse.3
= control target key start
LH: loop header
LB: loop body
LE: loop exit
PB: predicated region body
PF: predicated region fallthrough
CT: control target
= control target key end

     0   :  { %v2_v0 = vlaneseq  ;;  %s454_s0 = inlined_call_operand.vmem [shape: f32[2,32,256], index: 0, kind: input, shape index: {}]   ;;  %s455_s1 = inlined_call_operand.vmem [shape: f32[2,32,256], index: 1, kind: output, shape index: {}]  }
   0x2   :  { %v408_v1 = vsub.s32 127, %v2_v0 }
   0x4   :  { %4 = vset.pattern.permute.xlu0 %v408_v1 }
   0x5   :  { %s411_s6 = smov 0   ;;  %s413_s7 = smov 0  }
   0x6   :  { %s415_s8 = smov 0  }
   0x7 LB: > { %s323_s9 = sadd.s32 4294967295, %s396_s8   ;;  %s22_s10 = sadd.s32 1, %s392_s7  ;;  %s396_s8 = sphi %s415_s8, %s10_s8   ;;  %s392_s7 = sphi %s413_s7, %s457_s7   ;;  %s388_s6 = sphi %s411_s6, %s456_s6  }
   0x8   : > { %p23_p0 = scmp.ge.s32.totalorder %s22_s10, 2  ;;  %p325_p1 = scmp.ge.s32.totalorder %s396_s8, 2 }
   0x9   : > { %s45_s11 = sand.u32 (!%p325_p1), 1, %s396_s8   ;;  %s48_s12 = ssub.s32 (!%p325_p1), 1, %s392_s7 }
   0xa   : > { %s459_s10 = smov (%p23_p0, %s22_s10), 0  ;;  %43 = sbr.rel (%p325_p1) target bundleno = 18 (0x12), region = 16 }
   0xb   : > { %s326_s13 = sshll.u32 (!%p325_p1), %s45_s11, 6  ;;  %s327_s14 = sshll.u32 (!%p325_p1), %s48_s12, 3 }
   0xc   : > { %s56_s17 = scalar_lea.vmem (!%p325_p1), %s454_s0, %s327_s14  ;;  %s47_s18 = scalar_lea.vmem (!%p325_p1), [#allocation0], %s326_s13 }
   0xd   : > { %v98_v2 = vld [vmem:[%s56_s17] sm:$0xff] (!%p325_p1)  ;;  %v100_v3 = vld [vmem:[%s56_s17 + $0x10] sm:$0xff] (!%p325_p1) }
   0xe   : > { %v102_v4 = vld [vmem:[%s56_s17 + $0x20] sm:$0xff] (!%p325_p1)  ;;  %99 = vst [vmem:[%s47_s18] sm:$0xff] (!%p325_p1), %v98_v2  ;;  %101 = vst [vmem:[%s47_s18 + $0x8] sm:$0xff] (!%p325_p1), %v100_v3  ;;  %v104_v5 = vld [vmem:[%s56_s17 + $0x30] sm:$0xff] (!%p325_p1) }
   0xf   : > { %103 = vst [vmem:[%s47_s18 + $0x10] sm:$0xff] (!%p325_p1), %v102_v4  ;;  %v106_v6 = vld [vmem:[%s56_s17 + $0x40] sm:$0xff] (!%p325_p1)  ;;  %v108_v7 = vld [vmem:[%s56_s17 + $0x50] sm:$0xff] (!%p325_p1)  ;;  %105 = vst [vmem:[%s47_s18 + $0x18] sm:$0xff] (!%p325_p1), %v104_v5 }
  0x10   : > { %107 = vst [vmem:[%s47_s18 + $0x20] sm:$0xff] (!%p325_p1), %v106_v6  ;;  %109 = vst [vmem:[%s47_s18 + $0x28] sm:$0xff] (!%p325_p1), %v108_v7  ;;  %v110_v8 = vld [vmem:[%s56_s17 + $0x60] sm:$0xff] (!%p325_p1)  ;;  %v112_v9 = vld [vmem:[%s56_s17 + $0x70] sm:$0xff] (!%p325_p1) }
  0x11   : > { %111 = vst [vmem:[%s47_s18 + $0x30] sm:$0xff] %v110_v8  ;;  %113 = vst [vmem:[%s47_s18 + $0x38] sm:$0xff] %v112_v9 }
  0x12 PF: > { %p328_p2 = scmp.ge.s32.totalorder %s396_s8, 1  ;;  %p118_p3 = scmp.lt.s32.totalorder %s396_s8, 3 }
  0x14   : > { %p119_p4 = pnand %p328_p2, %p118_p3 }
  0x15   : > { %373 = vset.pattern.permute.xlu1 (!%p119_p4), %v408_v1  ;;  %s125_s19 = sand.u32 (!%p119_p4), 1, %s323_s9   ;;  %s346_s22 = sshll.u32 (!%p119_p4), %s388_s6, 3 }
  0x16   : > { %122 = sbr.rel (%p119_p4) target bundleno = 166 (0xa6), region = 54  ;;  %s329_s20 = sshll.u32 (!%p119_p4), %s125_s19, 6 }
  0x17   : > { %s127_s21 = scalar_lea.vmem (!%p119_p4), [#allocation0], %s329_s20  ;;  %s198_s25 = scalar_lea.vmem (!%p119_p4), %s455_s1, %s346_s22 }
  0x18   : > { %v333_v10 = vld [vmem:[%s127_s21 + $0x10] sm:$0xff] (!%p119_p4)  ;;  %v141_v11 = vld [vmem:[%s127_s21] sm:$0xff] (!%p119_p4)  ;;  %v335_v12 = vld [vmem:[%s127_s21 + $0x18] sm:$0xff] (!%p119_p4) }
  0x19   : > { %154 = vperm.xlu1 (!%p119_p4), %373, %v333_v10   ;;  %142 = vperm.xlu0 (!%p119_p4), %4, %v141_v11   ;;  %v331_v13 = vld [vmem:[%s127_s21 + $0x8] sm:$0xff] (!%p119_p4)  ;;  %v337_v15 = vld [vmem:[%s127_s21 + $0x20] sm:$0xff] (!%p119_p4)  ;;  %v343_v16 = vld [vmem:[%s127_s21 + $0x38] sm:$0xff] (!%p119_p4) }
  0x1a   : > { %v339_v14 = vld [vmem:[%s127_s21 + $0x28] sm:$0xff] (!%p119_p4)  ;;  %v341_v17 = vld [vmem:[%s127_s21 + $0x30] sm:$0xff] (!%p119_p4) }
  0x1d   : > { %160 = vperm.xlu1 %373, %v335_v12   ;;  %148 = vperm.xlu0 %4, %v331_v13  }
  0x21   : > { %172 = vperm.xlu1 %373, %v339_v14   ;;  %166 = vperm.xlu0 %4, %v337_v15  }
  0x25   : > { %184 = vperm.xlu1 %373, %v343_v16   ;;  %178 = vperm.xlu0 %4, %v341_v17  }
  0x98   : > { %v155_v18 = vpop.permute.xlu1 %154  ;;  %v143_v19 = vpop.permute.xlu0 %142 }
  0x99   : > { %245 = vst [vmem:[%s198_s25 + $0x20] sm:$0xff] %v155_v18  ;;  %241 = vst [vmem:[%s198_s25] sm:$0xff] %v143_v19 }
  0x9c   : > { %v161_v20 = vpop.permute.xlu1 %160  ;;  %v149_v21 = vpop.permute.xlu0 %148 }
  0x9d   : > { %247 = vst [vmem:[%s198_s25 + $0x30] sm:$0xff] %v161_v20  ;;  %243 = vst [vmem:[%s198_s25 + $0x10] sm:$0xff] %v149_v21 }
  0xa0   : > { %v173_v22 = vpop.permute.xlu1 %172  ;;  %v167_v23 = vpop.permute.xlu0 %166 }
  0xa1   : > { %251 = vst [vmem:[%s198_s25 + $0x50] sm:$0xff] %v173_v22  ;;  %249 = vst [vmem:[%s198_s25 + $0x40] sm:$0xff] %v167_v23 }
  0xa4   : > { %v185_v24 = vpop.permute.xlu1 %184  ;;  %v179_v25 = vpop.permute.xlu0 %178 }
  0xa5   : > { %255 = vst [vmem:[%s198_s25 + $0x70] sm:$0xff] %v185_v24  ;;  %253 = vst [vmem:[%s198_s25 + $0x60] sm:$0xff] %v179_v25 }
  0xa6 PF: > { %s10_s8 = sadd.s32 1, %s396_s8   ;;  %s456_s6 = smov %s392_s7 }
  0xa7   : > { %p7_p5 = scmp.ge.s32.totalorder %s10_s8, 4   ;;  %s457_s7 = smov %s459_s10 }
  0xa9   :  { %9 = sbr.rel (!%p7_p5) target bundleno = 7 (0x7), region = 132 }

// kernel: s4block_forward.1
= control target key start
LH: loop header
LB: loop body
LE: loop exit
PB: predicated region body
PF: predicated region fallthrough
CT: control target
= control target key end

     0   :  { %10 = vsyncpa [#allocation4], 0  ;;  %s1465_s0 = inlined_call_operand.vmem [shape: f32[2,32,512], index: 0, kind: input, shape index: {}]   ;;  %s1466_s1 = inlined_call_operand.vmem [shape: f32[2,32,256], index: 1, kind: input, shape index: {}]   ;;  %s1467_s2 = inlined_call_operand.vmem [shape: f32[32,1], index: 2, kind: input, shape index: {}]   ;;  %s1468_s3 = inlined_call_operand.vmem [shape: bf16[64,32], index: 3, kind: input, shape index: {}]   ;;  %s1469_s4 = inlined_call_operand.vmem [shape: f32[64,1], index: 4, kind: input, shape index: {}]   ;;  %s1470_s5 = inlined_call_operand.hbm [shape: f32[2,32,256], index: 5, kind: output, shape index: {}]  }
   0x1   :  { %12 = vsyncpa [#allocation4 + $0x1], 0  ;;  %s1142_s18 = smov 0   ;;  %s1144_s19 = smov 0  }
   0x2   :  { %s1146_s20 = smov 0   ;;  %s1148_s21 = smov 0  }
   0x3   :  { %s1150_s22 = smov 0   ;;  %s1152_s23 = smov 0  }
   0x4 LB: > { %s860_s24 = sadd.s32 4294967295, %s1106_s23   ;;  %s861_s25 = sadd.s32 4294967294, %s1106_s23   ;;  %s1106_s23 = sphi %s1152_s23, %s18_s23   ;;  %s1102_s22 = sphi %s1150_s22, %s1477_s22   ;;  %s1098_s21 = sphi %s1148_s21, %s1476_s21   ;;  %s1094_s20 = sphi %s1146_s20, %s1475_s20   ;;  %s1090_s19 = sphi %s1144_s19, %s1474_s19   ;;  %s1086_s18 = sphi %s1142_s18, %s1473_s18  }
   0x5   : > { %s30_s26 = sadd.s32 1, %s1102_s22  ;;  %s39_s27 = sadd.s32 1, %s1094_s20 }
   0x6   : > { %p32_p0 = scmp.ge.s32.totalorder %s30_s26, 2  ;;  %p46_p1 = scmp.ne.s32.totalorder %s1094_s20, %s1090_s19 }
   0x7   : > { %p47_p2 = scmp.eq.s32.totalorder %s1106_s23, 0  ;;  %p169_p3 = scmp.eq.s32.totalorder %s860_s24, 1 }
   0x8   : > { %s1479_s26 = smov (%p32_p0, %s30_s26), 0  ;;  %p174_p6 = scmp.ne.s32.totalorder %s1090_s19, %s1086_s18 }
   0x9   : > { %p48_p4 = por %p47_p2, %p46_p1  ;;  %p1181_p5 = por %p169_p3, %p46_p1 }
   0xa   : > { %s34_s29 = ssub.s32 %s1102_s22, %s1479_s26  ;;  %p175_p8 = scmp.eq.s32.totalorder %s861_s25, 1 }
   0xb   : > { %p37_p7 = scmp.eq.s32.totalorder %s34_s29, 0  ;;  %p863_p10 = scmp.ge.s32.totalorder %s1106_s23, 2 }
   0xc   : > { %p1192_p9 = por %p175_p8, %p174_p6 }
   0xd   : > { %s1190_s30 = scalar_select %p37_p7, %s1094_s20, %s39_s27  }
   0xe   : > { %200 = sbr.rel (%p863_p10) target bundleno = 29 (0x1d), region = 28 }
  0x15   : > { %203 = sbr.rel (!%p48_p4) target bundleno = 29 (0x1d), region = 32  ;;  %s205_s7 = sand.u32 (%p48_p4), 1, %s1094_s20  }
  0x16   : > { %s893_s8 = sshll.u32 (%p48_p4), %s1102_s22, 7  ;;  %s864_s9 = sshll.u32 (%p48_p4), %s205_s7, 6 }
  0x17   : > { %s212_s12 = scalar_lea.vmem (%p48_p4), %s1465_s0, %s893_s8  ;;  %s207_s13 = scalar_lea.vmem (%p48_p4), [#allocation2], %s864_s9 }
  0x18   : > { %v225_v0 = vld [vmem:[%s212_s12] sm:$0xff] (%p48_p4)  ;;  %v227_v1 = vld [vmem:[%s212_s12 + $0x8] sm:$0xff] (%p48_p4) }
  0x19   : > { %v229_v2 = vld [vmem:[%s212_s12 + $0x20] sm:$0xff] (%p48_p4)  ;;  %226 = vst [vmem:[%s207_s13] sm:$0xff] (%p48_p4), %v225_v0  ;;  %228 = vst [vmem:[%s207_s13 + $0x8] sm:$0xff] (%p48_p4), %v227_v1  ;;  %v231_v3 = vld [vmem:[%s212_s12 + $0x28] sm:$0xff] (%p48_p4) }
  0x1a   : > { %230 = vst [vmem:[%s207_s13 + $0x10] sm:$0xff] (%p48_p4), %v229_v2  ;;  %v233_v4 = vld [vmem:[%s212_s12 + $0x40] sm:$0xff] (%p48_p4)  ;;  %v235_v5 = vld [vmem:[%s212_s12 + $0x48] sm:$0xff] (%p48_p4)  ;;  %232 = vst [vmem:[%s207_s13 + $0x18] sm:$0xff] (%p48_p4), %v231_v3 }
  0x1b   : > { %234 = vst [vmem:[%s207_s13 + $0x20] sm:$0xff] (%p48_p4), %v233_v4  ;;  %236 = vst [vmem:[%s207_s13 + $0x28] sm:$0xff] (%p48_p4), %v235_v5  ;;  %v237_v6 = vld [vmem:[%s212_s12 + $0x60] sm:$0xff] (%p48_p4)  ;;  %v239_v7 = vld [vmem:[%s212_s12 + $0x68] sm:$0xff] (%p48_p4) }
  0x1c   : > { %238 = vst [vmem:[%s207_s13 + $0x30] sm:$0xff] %v237_v6  ;;  %240 = vst [vmem:[%s207_s13 + $0x38] sm:$0xff] %v239_v7 }
  0x1d PF: > { %p867_p11 = scmp.ge.s32.totalorder %s1106_s23, 1  ;;  %p258_p12 = scmp.lt.s32.totalorder %s1106_s23, 3 }
  0x1f   : > { %p259_p13 = pnand %p867_p11, %p258_p12 }
  0x20   : > { %v324_v8 = vld [vmem:[%s1467_s2 + $0x10] sm:$0xff] (!%p259_p13)  ;;  %v322_v9 = vld [vmem:[%s1467_s2] sm:$0xff] (!%p259_p13)  ;;  %v1108_v10 = vmov (!%p259_p13), 0   ;;  %v325_v11 = vld [vmem:[%s1467_s2 + $0x18] sm:$0xff] (!%p259_p13)  ;;  %p303_p0 = scmp.lt.s32.totalorder (!%p259_p13), %s1098_s21, 1  ;;  %s265_s9 = sand.u32 (!%p259_p13), 1, %s1090_s19  }
  0x21   : > { %262 = sbr.rel (%p259_p13) target bundleno = 506 (0x1fa), region = 59  ;;  %959 = vset.pattern.permute.xlu1 (!%p259_p13), %v1108_v10  ;;  %958 = vset.pattern.permute.xlu0 (!%p259_p13), %v1108_v10  ;;  %v323_v12 = vld [vmem:[%s1467_s2 + $0x8] sm:$0xff] (!%p259_p13)  ;;  %v530_v14 = vld [vmem:[%s1469_s4 + $0x20] sm:$0xff] (!%p259_p13)  ;;  %v533_v15 = vld [vmem:[%s1469_s4 + $0x38] sm:$0xff] (!%p259_p13)  ;;  %s1251_s11 = sshll.u32 (!%p259_p13), %s265_s9, 6  ;;  %vm594_vm0 = vcmask (!%p259_p13), 261120  }
  0x22   : > { %346 = vperm.xlu1 (!%p259_p13), %959, %v324_v8   ;;  %336 = vperm.xlu0 (!%p259_p13), %958, %v322_v9   ;;  %v531_v13 = vld [vmem:[%s1469_s4 + $0x28] sm:$0xff] (!%p259_p13)  ;;  %v532_v16 = vld [vmem:[%s1469_s4 + $0x30] sm:$0xff] (!%p259_p13)  ;;  %v526_v18 = vld [vmem:[%s1469_s4] sm:$0xff] (!%p259_p13)  ;;  %s267_s15 = scalar_lea.vmem (!%p259_p13), [#allocation2], %s1251_s11  ;;  %s895_s12 = sshll.u32 (!%p259_p13), %s1098_s21, 10 }
  0x23   : > { %639 = vmatprep.mubr.bf16.mxu0 (!%p259_p13), %v1108_v10  ;;  %659 = vmatprep.mubr.bf16.mxu1 (!%p259_p13), %v1108_v10  ;;  %v527_v17 = vld [vmem:[%s1469_s4 + $0x8] sm:$0xff] (!%p259_p13)  ;;  %v529_v19 = vld [vmem:[%s1469_s4 + $0x18] sm:$0xff] (!%p259_p13)  ;;  %v528_v20 = vld [vmem:[%s1469_s4 + $0x10] sm:$0xff] (!%p259_p13)  ;;  %s1109_s17 = smov (!%p259_p13), [#allocation3]  }
  0x24   : > { %v318_v25 = vld [vmem:[%s267_s15 + $0x20] sm:$0xff] (!%p259_p13)  ;;  %v319_v27 = vld [vmem:[%s267_s15 + $0x28] sm:$0xff] (!%p259_p13)  ;;  %v320_v44 = vld [vmem:[%s267_s15 + $0x30] sm:$0xff] (!%p259_p13)  ;;  %s1032_s24 = sshll.u32 (!%p259_p13), %s1109_s17, 4  ;;  %s1033_s24 = int_to_ptr.vmem [resolvable:$false] %s1032_s24 }
  0x25   : > { %v314_v29 = vld [vmem:[%s267_s15] sm:$0xff] (!%p259_p13)  ;;  %v315_v30 = vld [vmem:[%s267_s15 + $0x8] sm:$0xff] (!%p259_p13)  ;;  %v321_v50 = vld [vmem:[%s267_s15 + $0x38] sm:$0xff] (!%p259_p13)  ;;  %s1034_s25 = scalar_lea.vmem (!%p259_p13), %s1033_s24, 2048 }
  0x26   : > { %351 = vperm.xlu1 (!%p259_p13), %959, %v325_v11   ;;  %341 = vperm.xlu0 (!%p259_p13), %958, %v323_v12   ;;  %v316_v51 = vld [vmem:[%s267_s15 + $0x10] sm:$0xff] (!%p259_p13)  ;;  %v317_v52 = vld [vmem:[%s267_s15 + $0x18] sm:$0xff] (!%p259_p13)  ;;  %s1412_s15 = scalar_lea.hbm (!%p259_p13), %s1470_s5, %s895_s12 }
  0x28   : > { %s304_s8 = scalar_select %p303_p0, %s1098_s21, 1 }
  0x29   : > { %s1418_s21 = scalar_lea.sflag [#allocation4], %s265_s9 }
  0x2a   : > { %561 = vperm.xlu1 %959, %v531_v13   ;;  %556 = vperm.xlu0 %958, %v530_v14   ;;  %s894_s10 = sshll.u32 %s304_s8, 6 }
  0x2b   : > { %s310_s14 = scalar_lea.vmem %s1466_s1, %s894_s10  ;;  %s300_s10 = scalar_lea.vmem [#allocation3], %s1251_s11 }
  0x2c   : > { %v330_v21 = vld [vmem:[%s310_s14 + $0x20] sm:$0xff]  ;;  %v331_v22 = vld [vmem:[%s310_s14 + $0x28] sm:$0xff]  ;;  %v332_v35 = vld [vmem:[%s310_s14 + $0x30] sm:$0xff]  ;;  %s760_s13 = sshll.u32 %s300_s10, 4  ;;  %s1414_s13 = int_to_ptr.vmem [resolvable:$true] %s760_s13 }
  0x2d   : > { %v326_v23 = vld [vmem:[%s310_s14] sm:$0xff]  ;;  %v327_v24 = vld [vmem:[%s310_s14 + $0x8] sm:$0xff]  ;;  %v333_v40 = vld [vmem:[%s310_s14 + $0x38] sm:$0xff]  ;;  %s1028_s16 = scalar_lea.vmem %s1414_s13, 1024  ;;  %p1035_p4 = scmp.lt.s32.totalorder %s1414_s13, %s1033_s24 }
  0x2e   : > { %571 = vperm.xlu1 %959, %v533_v15   ;;  %566 = vperm.xlu0 %958, %v532_v16   ;;  %v328_v41 = vld [vmem:[%s310_s14 + $0x10] sm:$0xff]  ;;  %v329_v42 = vld [vmem:[%s310_s14 + $0x18] sm:$0xff]  ;;  %p1029_p1 = scmp.ne.s32.totalorder %s1414_s13, %s1028_s16  ;;  %p1036_p6 = scmp.lt.s32.totalorder %s1034_s25, %s1028_s16 }
  0x30   : > { %p1030_p2 = pnand %p1029_p1, %p1181_p5  ;;  %p1037_p7 = por %p1036_p6, %p1035_p4 }
  0x32   : > { %541 = vperm.xlu1 %959, %v527_v17   ;;  %536 = vperm.xlu0 %958, %v526_v18   ;;  %p1031_p3 = pneg %p1030_p2 }
  0x34   : > { %p1038_p8 = pnand %p1037_p7, %p1031_p3 }
  0x36   : > { %551 = vperm.xlu1 %959, %v529_v19   ;;  %546 = vperm.xlu0 %958, %v528_v20  }
  0xa1   : > { %v347_v26 = vpop.permute.xlu1 %346  ;;  %v337_v28 = vpop.permute.xlu0 %336 }
  0xa2   : > { %v358_v31 = vmul.f32 %v347_v26, %v330_v21  ;;  %v359_v32 = vmul.f32 %v347_v26, %v331_v22  ;;  %v354_v33 = vmul.f32 %v337_v28, %v326_v23  ;;  %v355_v34 = vmul.f32 %v337_v28, %v327_v24 }
  0xa4   : > { %v1257_v36 = vadd.f32 %v358_v31, %v318_v25  ;;  %v1259_v37 = vadd.f32 %v359_v32, %v319_v27  ;;  %v1261_v38 = vadd.f32 %v354_v33, %v314_v29  ;;  %v1263_v39 = vadd.f32 %v355_v34, %v315_v30 }
  0xa5   : > { %v352_v43 = vpop.permute.xlu1 %351  ;;  %v342_v45 = vpop.permute.xlu0 %341 }
  0xa6   : > { %v374_v46 = vmul.f32 %v1257_v36, %v1257_v36  ;;  %v375_v47 = vmul.f32 %v1259_v37, %v1259_v37  ;;  %v370_v48 = vmul.f32 %v1261_v38, %v1261_v38  ;;  %v371_v49 = vmul.f32 %v1263_v39, %v1263_v39 }
  0xa7   : > { %v360_v53 = vmul.f32 %v352_v43, %v332_v35  ;;  %v361_v54 = vmul.f32 %v352_v43, %v333_v40  ;;  %v356_v55 = vmul.f32 %v342_v45, %v328_v41  ;;  %v357_v56 = vmul.f32 %v342_v45, %v329_v42 }
  0xa8   : > { %v382_v57 = vmul.f32 %v374_v46, %v1257_v36  ;;  %v383_v58 = vmul.f32 %v375_v47, %v1259_v37  ;;  %v378_v59 = vmul.f32 %v370_v48, %v1261_v38  ;;  %v379_v60 = vmul.f32 %v371_v49, %v1263_v39 }
  0xa9   : > { %v1277_v61 = vadd.f32 %v360_v53, %v320_v44  ;;  %v1279_v62 = vadd.f32 %v361_v54, %v321_v50  ;;  %v1281_v63 = vadd.f32 %v356_v55, %v316_v51  ;;  %v1283_v0 = vadd.f32 %v357_v56, %v317_v52 }
  0xaa   : > { %v390_v1 = vmul.f32 0.044715, %v382_v57  ;;  %v391_v2 = vmul.f32 0.044715, %v383_v58  ;;  %v386_v3 = vmul.f32 0.044715, %v378_v59 }
  0xab   : > { %v387_v4 = vmul.f32 0.044715, %v379_v60  ;;  %v376_v5 = vmul.f32 %v1277_v61, %v1277_v61  ;;  %v377_v6 = vmul.f32 %v1279_v62, %v1279_v62  ;;  %v372_v7 = vmul.f32 %v1281_v63, %v1281_v63 }
  0xac   : > { %v398_v8 = vadd.f32 %v390_v1, %v1257_v36  ;;  %v399_v9 = vadd.f32 %v391_v2, %v1259_v37  ;;  %v394_v11 = vadd.f32 %v386_v3, %v1261_v38  ;;  %v373_v12 = vmul.f32 %v1283_v0, %v1283_v0 }
  0xad   : > { %v395_v13 = vadd.f32 %v387_v4, %v1263_v39  ;;  %v384_v14 = vmul.f32 %v376_v5, %v1277_v61  ;;  %v385_v15 = vmul.f32 %v377_v6, %v1279_v62  ;;  %v380_v16 = vmul.f32 %v372_v7, %v1281_v63 }
  0xae   : > { %v406_v17 = vmul.f32 0.7978846, %v398_v8  ;;  %v407_v18 = vmul.f32 0.7978846, %v399_v9  ;;  %v402_v19 = vmul.f32 0.7978846, %v394_v11  ;;  %v381_v20 = vmul.f32 %v373_v12, %v1283_v0 }
  0xaf   : > { %v403_v21 = vmul.f32 0.7978846, %v395_v13  ;;  %v392_v22 = vmul.f32 0.044715, %v384_v14  ;;  %v393_v23 = vmul.f32 0.044715, %v385_v15 }
  0xb0   : > { %964 = vtanh.f32 %v406_v17  ;;  %v388_v24 = vmul.f32 0.044715, %v380_v16  ;;  %v389_v25 = vmul.f32 0.044715, %v381_v20 }
  0xb1   : > { %966 = vtanh.f32 %v407_v18  ;;  %v400_v26 = vadd.f32 %v392_v22, %v1277_v61  ;;  %v401_v27 = vadd.f32 %v393_v23, %v1279_v62 }
  0xb2   : > { %968 = vtanh.f32 %v402_v19  ;;  %v396_v28 = vadd.f32 %v388_v24, %v1281_v63  ;;  %v397_v29 = vadd.f32 %v389_v25, %v1283_v0 }
  0xb3   : > { %970 = vtanh.f32 %v403_v21  ;;  %v408_v30 = vmul.f32 0.7978846, %v400_v26  ;;  %v409_v31 = vmul.f32 0.7978846, %v401_v27 }
  0xb4   : > { %v404_v32 = vmul.f32 0.7978846, %v396_v28  ;;  %v405_v33 = vmul.f32 0.7978846, %v397_v29 }
  0xb5   : > { %972 = vtanh.f32 %v408_v30 }
  0xb6   : > { %974 = vtanh.f32 %v409_v31 }
  0xb7   : > { %976 = vtanh.f32 %v404_v32 }
  0xb8   : > { %978 = vtanh.f32 %v405_v33 }
  0xba   : > { %v965_v34 = vpop.eup %964 }
  0xbb   : > { %v967_v35 = vpop.eup %966  ;;  %v422_v40 = vadd.f32 1.0, %v965_v34 }
  0xbc   : > { %v969_v41 = vpop.eup %968  ;;  %v423_v42 = vadd.f32 1.0, %v967_v35 }
  0xbd   : > { %v971_v43 = vpop.eup %970  ;;  %v430_v44 = vmul.f32 0.5, %v422_v40  ;;  %v418_v45 = vadd.f32 1.0, %v969_v41 }
  0xbe   : > { %v431_v46 = vmul.f32 0.5, %v423_v42  ;;  %v419_v47 = vadd.f32 1.0, %v971_v43 }
  0xbf   : > { %v973_v48 = vpop.eup %972  ;;  %v1306_v49 = vmul.f32 %v430_v44, %v1257_v36  ;;  %v426_v50 = vmul.f32 0.5, %v418_v45 }
  0xc0   : > { %v975_v51 = vpop.eup %974  ;;  %v1309_v52 = vmul.f32 %v431_v46, %v1259_v37  ;;  %v424_v53 = vadd.f32 1.0, %v973_v48  ;;  %v427_v54 = vmul.f32 0.5, %v419_v47 }
  0xc1   : > { %v977_v55 = vpop.eup %976  ;;  %v425_v56 = vadd.f32 1.0, %v975_v51  ;;  %v1312_v57 = vmul.f32 %v426_v50, %v1261_v38  ;;  %v446_v58 = vmul.f32 %v1306_v49, %v1306_v49 }
  0xc2   : > { %v979_v59 = vpop.eup %978  ;;  %v432_v60 = vmul.f32 0.5, %v424_v53  ;;  %v1317_v36 = vmul.f32 %v427_v54, %v1263_v39  ;;  %v420_v1 = vadd.f32 1.0, %v977_v55  ;;  %v447_v37 = vmul.f32 %v1309_v52, %v1309_v52 }
  0xc3   : > { %v433_v2 = vmul.f32 0.5, %v425_v56  ;;  %v421_v3 = vadd.f32 1.0, %v979_v59  ;;  %v442_v4 = vmul.f32 %v1312_v57, %v1312_v57  ;;  %v454_v38 = vmul.f32 %v446_v58, %v1306_v49 }
  0xc4   : > { %v1325_v5 = vmul.f32 %v432_v60, %v1277_v61  ;;  %v443_v6 = vmul.f32 %v1317_v36, %v1317_v36  ;;  %v428_v7 = vmul.f32 0.5, %v420_v1  ;;  %v455_v39 = vmul.f32 %v447_v37, %v1309_v52 }
  0xc5   : > { %v1331_v8 = vmul.f32 %v433_v2, %v1279_v62  ;;  %v429_v9 = vmul.f32 0.5, %v421_v3  ;;  %v450_v11 = vmul.f32 %v442_v4, %v1312_v57  ;;  %v462_v12 = vmul.f32 0.044715, %v454_v38 }
  0xc6   : > { %v451_v13 = vmul.f32 %v443_v6, %v1317_v36  ;;  %v1336_v14 = vmul.f32 %v428_v7, %v1281_v63  ;;  %v463_v61 = vmul.f32 0.044715, %v455_v39  ;;  %v448_v15 = vmul.f32 %v1325_v5, %v1325_v5 }
  0xc7   : > { %v1341_v16 = vmul.f32 %v429_v9, %v1283_v0  ;;  %v458_v17 = vmul.f32 0.044715, %v450_v11  ;;  %v449_v62 = vmul.f32 %v1331_v8, %v1331_v8  ;;  %v470_v18 = vadd.f32 %v462_v12, %v1306_v49 }
  0xc8   : > { %v459_v19 = vmul.f32 0.044715, %v451_v13  ;;  %v444_v20 = vmul.f32 %v1336_v14, %v1336_v14  ;;  %v471_v63 = vadd.f32 %v463_v61, %v1309_v52  ;;  %v456_v21 = vmul.f32 %v448_v15, %v1325_v5 }
  0xc9   : > { %v445_v22 = vmul.f32 %v1341_v16, %v1341_v16  ;;  %v466_v0 = vadd.f32 %v458_v17, %v1312_v57  ;;  %v457_v23 = vmul.f32 %v449_v62, %v1331_v8  ;;  %v478_v24 = vmul.f32 0.7978846, %v470_v18 }
  0xca   : > { %v467_v25 = vadd.f32 %v459_v19, %v1317_v36  ;;  %v452_v26 = vmul.f32 %v444_v20, %v1336_v14  ;;  %v464_v27 = vmul.f32 0.044715, %v456_v21  ;;  %v479_v31 = vmul.f32 0.7978846, %v471_v63 }
  0xcb   : > { %v453_v28 = vmul.f32 %v445_v22, %v1341_v16  ;;  %v474_v29 = vmul.f32 0.7978846, %v466_v0  ;;  %v465_v30 = vmul.f32 0.044715, %v457_v23  ;;  %980 = vtanh.f32 %v478_v24 }
  0xcc   : > { %v475_v32 = vmul.f32 0.7978846, %v467_v25  ;;  %v460_v33 = vmul.f32 0.044715, %v452_v26  ;;  %v472_v34 = vadd.f32 %v464_v27, %v1325_v5 }
  0xcd   : > { %v461_v35 = vmul.f32 0.044715, %v453_v28  ;;  %982 = vtanh.f32 %v474_v29  ;;  %v473_v40 = vadd.f32 %v465_v30, %v1331_v8 }
  0xce   : > { %984 = vtanh.f32 %v475_v32  ;;  %v468_v41 = vadd.f32 %v460_v33, %v1336_v14  ;;  %v480_v42 = vmul.f32 0.7978846, %v472_v34 }
  0xcf   : > { %v469_v43 = vadd.f32 %v461_v35, %v1341_v16  ;;  %v481_v44 = vmul.f32 0.7978846, %v473_v40  ;;  %986 = vtanh.f32 %v479_v31 }
  0xd0   : > { %v476_v45 = vmul.f32 0.7978846, %v468_v41  ;;  %988 = vtanh.f32 %v480_v42 }
  0xd1   : > { %v477_v46 = vmul.f32 0.7978846, %v469_v43  ;;  %990 = vtanh.f32 %v481_v44 }
  0xd2   : > { %992 = vtanh.f32 %v476_v45 }
  0xd3   : > { %994 = vtanh.f32 %v477_v46 }
  0xd5   : > { %v981_v47 = vpop.eup %980 }
  0xd6   : > { %v494_v39 = vadd.f32 1.0, %v981_v47 }
  0xd7   : > { %v983_v48 = vpop.eup %982 }
  0xd8   : > { %v985_v50 = vpop.eup %984  ;;  %v490_v53 = vadd.f32 1.0, %v983_v48  ;;  %v502_v19 = vmul.f32 0.5, %v494_v39 }
  0xd9   : > { %v987_v51 = vpop.eup %986  ;;  %v491_v55 = vadd.f32 1.0, %v985_v50 }
  0xda   : > { %v989_v54 = vpop.eup %988  ;;  %v495_v59 = vadd.f32 1.0, %v987_v51  ;;  %v498_v2 = vmul.f32 0.5, %v490_v53 }
  0xdb   : > { %v991_v56 = vpop.eup %990  ;;  %v496_v3 = vadd.f32 1.0, %v989_v54  ;;  %v499_v38 = vmul.f32 0.5, %v491_v55 }
  0xdc   : > { %v993_v58 = vpop.eup %992  ;;  %v497_v60 = vadd.f32 1.0, %v991_v56  ;;  %v503_v11 = vmul.f32 0.5, %v495_v59  ;;  %v506_v12 = vmul.f32 %v498_v2, %v1312_v57  ;;  %v510_v57 = vmul.f32 %v502_v19, %v1306_v49  ;;  %v962_v49 = vld [vmem:[%s1468_s3 + $0x8] sm:$0xff]  }
  0xdd   : > { %v995_v1 = vpop.eup %994  ;;  %v492_v37 = vadd.f32 1.0, %v993_v58  ;;  %v504_v61 = vmul.f32 0.5, %v496_v3  ;;  %v507_v15 = vmul.f32 %v499_v38, %v1317_v36 }
  0xde   : > { %v493_v4 = vadd.f32 1.0, %v995_v1  ;;  %v505_v6 = vmul.f32 0.5, %v497_v60  ;;  %v511_v63 = vmul.f32 %v503_v11, %v1309_v52  ;;  %v961_v52 = vld [vmem:[%s1468_s3 + $0x10] sm:$0xff]  }
  0xdf   : > { %v500_v7 = vmul.f32 0.5, %v492_v37  ;;  %v512_v21 = vmul.f32 %v504_v61, %v1325_v5  ;;  %v963_v5 = vld [vmem:[%s1468_s3 + $0x18] sm:$0xff]  }
  0xe0   : > { %v501_v9 = vmul.f32 0.5, %v493_v4  ;;  %v513_v62 = vmul.f32 %v505_v6, %v1331_v8  ;;  %v960_v8 = vld [vmem:[%s1468_s3] sm:$0xff]  }
  0xe1   : > { %v508_v13 = vmul.f32 %v500_v7, %v1336_v14  ;;  %v524_v36 = vpack.c.bf16 %v512_v21, %v510_v57  ;;  %v562_v14 = vpop.permute.xlu1 %561 }
  0xe2   : > { %v509_v17 = vmul.f32 %v501_v9, %v1341_v16  ;;  %v525_v22 = vpack.c.bf16 %v513_v62, %v511_v63  ;;  %v557_v16 = vpop.permute.xlu0 %556 }
  0xe3   : > { %v522_v18 = vpack.c.bf16 %v508_v13, %v506_v12 }
  0xe4   : > { %v523_v20 = vpack.c.bf16 %v509_v17, %v507_v15 }
  0xe5   : > { %v572_v41 = vpop.permute.xlu1 %571 }
  0xe6   : > { %607 = vmatprep.subr.bf16.mxu0 %v523_v20  ;;  %896 = vmatprep.subr.bf16.mxu1 %v523_v20  ;;  %v567_v42 = vpop.permute.xlu0 %566 }
  0xe7   : > { %608 = vmatpush1.bf16.msra.mxu0 %v522_v18  ;;  %898 = vmatpush1.bf16.msra.mxu1 %v522_v18 }
  0xe8   : > { %609 = vmatprep.subr.bf16.mxu0 %v525_v22  ;;  %897 = vmatprep.subr.bf16.mxu1 %v525_v22 }
  0xe9   : > { %v542_v63 = vpop.permute.xlu1 %541 }
  0xea   : > { %v537_v17 = vpop.permute.xlu0 %536 }
  0xeb   : > { %610 = vmatpush1.bf16.msra.mxu0 %v524_v36  ;;  %899 = vmatpush1.bf16.msra.mxu1 %v524_v36 }
  0xee   : > { %876 = vmatmul.mubr.msk.bf16.vlgmr.msra.gmra.mrb[0].mxu0 %vm594_vm0, %v960_v8  ;;  %878 = vmatmul.mubr.msk.bf16.vlgmr.msra.gmra.mrb[0].mxu1 %vm594_vm0, %v961_v52 }
  0xef   : > { %649 = vmatprep.mubr.bf16.mxu0 %v1108_v10  ;;  %669 = vmatprep.mubr.bf16.mxu1 %v1108_v10 }
  0xf6   : > { %877 = vmatmul.mubr.msk.bf16.gmra.mrb[4].mxu0 %vm594_vm0, %v962_v49  ;;  %879 = vmatmul.mubr.msk.bf16.gmra.mrb[4].mxu1 %vm594_vm0, %v963_v5 }
 0x1c1   : > { %v1383_v0 = vpop.f32.mrb[0].mxu0  ;;  %v661_v23 = vpop.f32.mrb[0].mxu1 }
 0x1c2   : > { %v662_v24 = vadd.f32 %v661_v23, %v557_v16  ;;  %v1385_v25 = vpop.f32.mrb[1].mxu0  ;;  %v663_v26 = vpop.f32.mrb[1].mxu1  ;;  %v642_v18 = vadd.f32 %v1383_v0, %v537_v17 }
 0x1c3   : > { %v664_v10 = vadd.f32 %v663_v26, %v557_v16  ;;  %v1387_v27 = vpop.f32.mrb[2].mxu0  ;;  %v665_v28 = vpop.f32.mrb[2].mxu1  ;;  %v644_v21 = vadd.f32 %v1385_v25, %v537_v17 }
 0x1c4   : > { %v880_v29 = vmul.f32 -1.442695, %v662_v24  ;;  %v666_v30 = vadd.f32 %v665_v28, %v562_v14  ;;  %v1389_v31 = vpop.f32.mrb[3].mxu0  ;;  %v667_v32 = vpop.f32.mrb[3].mxu1  ;;  %v646_v36 = vadd.f32 %v1387_v27, %v542_v63 }
 0x1c5   : > { %v881_v33 = vmul.f32 -1.442695, %v664_v10  ;;  %v668_v34 = vadd.f32 %v667_v32, %v562_v14  ;;  %v648_v49 = vadd.f32 %v1389_v31, %v542_v63  ;;  %v547_v0 = vpop.permute.xlu0 %546  ;;  %v552_v25 = vpop.permute.xlu1 %551 }
 0x1c6   : > { %996 = vpow2.f32 %v880_v29  ;;  %v882_v35 = vmul.f32 -1.442695, %v666_v30 }
 0x1c7   : > { %998 = vpow2.f32 %v881_v33  ;;  %v883_v40 = vmul.f32 -1.442695, %v668_v34 }
 0x1c8   : > { %1000 = vpow2.f32 %v882_v35 }
 0x1c9   : > { %1002 = vpow2.f32 %v883_v40  ;;  %v1391_v43 = vpop.f32.mrb[4].mxu0  ;;  %v671_v44 = vpop.f32.mrb[4].mxu1 }
 0x1ca   : > { %v672_v45 = vadd.f32 %v671_v44, %v567_v42  ;;  %v1393_v46 = vpop.f32.mrb[5].mxu0  ;;  %v673_v47 = vpop.f32.mrb[5].mxu1  ;;  %v652_v23 = vadd.f32 %v1391_v43, %v547_v0 }
 0x1cb   : > { %v674_v48 = vadd.f32 %v673_v47, %v567_v42  ;;  %v1395_v50 = vpop.f32.mrb[6].mxu0  ;;  %v675_v51 = vpop.f32.mrb[6].mxu1  ;;  %v654_v26 = vadd.f32 %v1393_v46, %v547_v0 }
 0x1cc   : > { %v884_v53 = vmul.f32 -1.442695, %v672_v45  ;;  %v676_v54 = vadd.f32 %v675_v51, %v572_v41  ;;  %v1397_v55 = vpop.f32.mrb[7].mxu0  ;;  %v677_v56 = vpop.f32.mrb[7].mxu1  ;;  %v656_v28 = vadd.f32 %v1395_v50, %v552_v25 }
 0x1cd   : > { %v885_v58 = vmul.f32 -1.442695, %v674_v48  ;;  %v678_v59 = vadd.f32 %v677_v56, %v572_v41  ;;  %v658_v31 = vadd.f32 %v1397_v55, %v552_v25 }
 0x1ce   : > { %1004 = vpow2.f32 %v884_v53  ;;  %v886_v60 = vmul.f32 -1.442695, %v676_v54 }
 0x1cf   : > { %1006 = vpow2.f32 %v885_v58  ;;  %v887_v1 = vmul.f32 -1.442695, %v678_v59 }
 0x1d0   : > { %v997_v37 = vpop.eup %996  ;;  %1008 = vpow2.f32 %v886_v60 }
 0x1d1   : > { %v999_v2 = vpop.eup %998  ;;  %v704_v3 = vadd.f32 1.0, %v997_v37  ;;  %1010 = vpow2.f32 %v887_v1 }
 0x1d2   : > { %v1001_v4 = vpop.eup %1000  ;;  %v705_v38 = vadd.f32 1.0, %v999_v2 }
 0x1d3   : > { %v1003_v6 = vpop.eup %1002  ;;  %1012 = vrcp.f32 %v704_v3  ;;  %v706_v7 = vadd.f32 1.0, %v1001_v4 }
 0x1d4   : > { %1014 = vrcp.f32 %v705_v38  ;;  %v707_v39 = vadd.f32 1.0, %v1003_v6 }
 0x1d5   : > { %1016 = vrcp.f32 %v706_v7 }
 0x1d6   : > { %1018 = vrcp.f32 %v707_v39 }
 0x1d8   : > { %v1005_v9 = vpop.eup %1004 }
 0x1d9   : > { %v1007_v11 = vpop.eup %1006  ;;  %v708_v12 = vadd.f32 1.0, %v1005_v9 }
 0x1da   : > { %v1009_v13 = vpop.eup %1008  ;;  %v709_v61 = vadd.f32 1.0, %v1007_v11 }
 0x1db   : > { %v1011_v15 = vpop.eup %1010  ;;  %1020 = vrcp.f32 %v708_v12  ;;  %v710_v62 = vadd.f32 1.0, %v1009_v13 }
 0x1dc   : > { %1022 = vrcp.f32 %v709_v61  ;;  %v711_v19 = vadd.f32 1.0, %v1011_v15 }
 0x1dd   : > { %v1013_v20 = vpop.eup %1012  ;;  %1024 = vrcp.f32 %v710_v62 }
 0x1de   : > { %v1015_v22 = vpop.eup %1014  ;;  %v728_v57 = vmul.f32 %v1013_v20, %v642_v18  ;;  %1026 = vrcp.f32 %v711_v19 }
 0x1df   : > { %v1017_v8 = vpop.eup %1016  ;;  %v729_v52 = vmul.f32 %v1015_v22, %v644_v21 }
 0x1e0   : > { %v1019_v5 = vpop.eup %1018  ;;  %736 = vst [vmem:[%s300_s10] sm:$0xff] %v728_v57  ;;  %v730_v14 = vmul.f32 %v1017_v8, %v646_v36 }
 0x1e1   : > { %737 = vst [vmem:[%s300_s10 + $0x8] sm:$0xff] %v729_v52  ;;  %v731_v16 = vmul.f32 %v1019_v5, %v648_v49 }
 0x1e2   : > { %738 = vst [vmem:[%s300_s10 + $0x10] sm:$0xff] %v730_v14 }
 0x1e3   : > { %739 = vst [vmem:[%s300_s10 + $0x18] sm:$0xff] %v731_v16 }
 0x1e5   : > { %v1021_v24 = vpop.eup %1020 }
 0x1e6   : > { %v1023_v10 = vpop.eup %1022  ;;  %v732_v27 = vmul.f32 %v1021_v24, %v652_v23 }
 0x1e7   : > { %v1025_v29 = vpop.eup %1024  ;;  %v733_v30 = vmul.f32 %v1023_v10, %v654_v26 }
 0x1e8   : > { %v1027_v32 = vpop.eup %1026  ;;  %740 = vst [vmem:[%s300_s10 + $0x20] sm:$0xff] %v732_v27  ;;  %v734_v33 = vmul.f32 %v1025_v29, %v656_v28 }
 0x1e9   : > { %741 = vst [vmem:[%s300_s10 + $0x28] sm:$0xff] %v733_v30  ;;  %v735_v34 = vmul.f32 %v1027_v32, %v658_v31 }
 0x1ea   : > { %742 = vst [vmem:[%s300_s10 + $0x30] sm:$0xff] %v734_v33 }
 0x1eb   : > { %743 = vst [vmem:[%s300_s10 + $0x38] sm:$0xff] %v735_v34 }
 0x1ec   : > { %1041 = shalt.err (!%p1038_p8)
}
 0x1ed   : > { %s1042_s9 = scalar_lea.hbm %s1412_s15, 1024  ;;  %s1046_s7 = scalar_lea.hbm %s1470_s5, 2048 }
 0x1ee   : > { %p1043_p11 = scmp.ne.s32.totalorder %s1412_s15, %s1042_s9  ;;  %p1047_p0 = scmp.lt.u32.totalorder %s1412_s15, %s1470_s5 }
 0x1ef   : > { %p1048_p1 = scmp.lt.u32.totalorder %s1046_s7, %s1042_s9  ;;  %p1050_p3 = scmp.lt.u32.totalorder %s1042_s9, %s1412_s15 }
 0x1f0   : > { %p1044_p12 = pnand %p1043_p11, %p1181_p5 }
 0x1f1   : > { %p1049_p2 = por %p1048_p1, %p1047_p0 }
 0x1f2   : > { %p1045_p13 = pneg %p1044_p12 }
 0x1f3   : > { %p1051_p4 = por %p1050_p3, %p1049_p2 }
 0x1f5   : > { %p1052_p6 = pnand %p1051_p4, %p1045_p13 }
 0x1f7   : > { %1055 = shalt.err (!%p1052_p6)
}
 0x1f8   : > { %s1110_s12 = smov 256   ;;  %s1111_s11 = smov 16  }
 0x1f9   : > { %900 = dma.vmem_to_hbm [thread:$0]  (%p1181_p5), %s1414_s13, 1024, %s1412_s15, %s1418_s21, %s1110_s12, %s1110_s12, %s1111_s11  }
 0x1fa PF: > { %s775_s14 = sand.u32 1, %s1086_s18   ;;  %p903_p7 = pnand %p863_p10, %p1192_p9 }
 0x1fb   : > { %s776_s16 = scalar_lea.sflag [#allocation4], %s775_s14 }
 0x1fc   : > { %1081 = dma.done.wait (!%p903_p7), %s776_s16, 1024  }
 0x1fd   : > { %1083 = vsyncadd (!%p903_p7), %s776_s16, 4294966272  ;;  %s18_s23 = sadd.s32 1, %s1106_s23   ;;  %s1473_s18 = smov %s1090_s19 }
 0x1fe   : > { %p15_p8 = scmp.ge.s32.totalorder %s18_s23, 4   ;;  %s1474_s19 = smov %s1094_s20 }
 0x1ff   : > { %s1475_s20 = smov %s1190_s30  ;;  %s1476_s21 = smov %s1102_s22 }
 0x200   : > { %s1477_s22 = smov %s1479_s26  ;;  %17 = sbr.rel (!%p15_p8) target bundleno = 4 (0x4), region = 106 }
 0x207   :  { %781 = vsyncpa [#allocation4], 1 }
 0x208   :  { %783 = vsyncpa [#allocation4 + $0x1], 1 }

// kernel: custom-call
= control target key start
LH: loop header
LB: loop body
LE: loop exit
PB: predicated region body
PF: predicated region fallthrough
CT: control target
= control target key end

     0   :  { %2 = vsyncpa [#allocation0], 0  ;;  %s61_s0 = inlined_call_operand.hbm [shape: c64[32,8], index: 0, kind: input, shape index: {}]   ;;  %s62_s1 = inlined_call_operand.vmem [shape: f32[32,8], index: 1, kind: output, shape index: {}]  }
   0x1   :  { %s3_s8 = sshll.u32 %s62_s1, 4  ;;  %s9_s11 = scalar_lea.hbm %s61_s0, 128  ;;  %s4_s8 = int_to_ptr.vmem [resolvable:$true] %s3_s8 }
   0x2   :  { %p10_p0 = scmp.ne.s32.totalorder %s61_s0, %s9_s11  ;;  %s11_s16 = scalar_lea.hbm %s61_s0, 256 }
   0x3   :  { %p12_p1 = scmp.lt.u32.totalorder %s11_s16, %s9_s11  ;;  %p13_p2 = scmp.lt.u32.totalorder %s9_s11, %s61_s0 }
   0x5   :  { %p14_p3 = por %p13_p2, %p12_p1 }
   0x7   :  { %p15_p4 = pnand %p14_p3, %p10_p0 }
   0x9   :  { %18 = shalt.err (!%p15_p4)  }
   0xa   :  { %s19_s1 = scalar_lea.vmem %s4_s8, 128  ;;  %p24_p6 = scmp.lt.s32.totalorder %s4_s8, %s4_s8 }
   0xb   :  { %p20_p5 = scmp.ne.s32.totalorder %s4_s8, %s19_s1  ;;  %p25_p7 = scmp.lt.s32.totalorder %s19_s1, %s19_s1 }
   0xd   :  { %p26_p8 = por %p25_p7, %p24_p6 }
   0xf   :  { %p27_p9 = pnand %p26_p8, %p20_p5 }
  0x11   :  { %30 = shalt.err (!%p27_p9)  }
  0x12   :  { %6 = dma.hbm_to_vmem [thread:$0]  %s61_s0, 128, %s4_s8, [#allocation0] }
  0x13   :  { %31 = dma.done.wait [#allocation0], 128  }
  0x14   :  { %32 = vsyncadd [#allocation0], 4294967168 }
  0x15   :  { %8 = vsyncpa [#allocation0], 1 }

// kernel: custom-call.1
= control target key start
LH: loop header
LB: loop body
LE: loop exit
PB: predicated region body
PF: predicated region fallthrough
CT: control target
= control target key end

     0   :  { %s59_s0 = inlined_call_operand.hbm [shape: c64[32,8], index: 0, kind: input, shape index: {}]   ;;  %s60_s1 = inlined_call_operand.vmem [shape: f32[32,8], index: 1, kind: output, shape index: {}]  }
   0x1   :  { %s2_s8 = scalar_lea.hbm %s59_s0, 128 }
   0x2   :  { %3 = vsyncpa [#allocation0], 0  ;;  %s4_s11 = sshll.u32 %s60_s1, 4  ;;  %s34_s14 = scalar_lea.hbm %s59_s0, 256  ;;  %s5_s11 = int_to_ptr.vmem [resolvable:$true] %s4_s11 }
   0x3   :  { %p11_p0 = scmp.ne.s32.totalorder %s2_s8, %s34_s14  ;;  %p13_p1 = scmp.lt.u32.totalorder %s2_s8, %s59_s0 }
   0x4   :  { %p14_p2 = scmp.lt.u32.totalorder %s34_s14, %s34_s14  ;;  %p16_p4 = scmp.lt.u32.totalorder %s34_s14, %s2_s8 }
   0x6   :  { %p15_p3 = por %p14_p2, %p13_p1 }
   0x8   :  { %p17_p5 = por %p16_p4, %p15_p3 }
   0xa   :  { %p18_p6 = pnand %p17_p5, %p11_p0 }
   0xc   :  { %21 = shalt.err (!%p18_p6)  }
   0xd   :  { %s22_s17 = scalar_lea.vmem %s5_s11, 128  ;;  %p27_p8 = scmp.lt.s32.totalorder %s5_s11, %s5_s11 }
   0xe   :  { %p23_p7 = scmp.ne.s32.totalorder %s5_s11, %s22_s17  ;;  %p28_p9 = scmp.lt.s32.totalorder %s22_s17, %s22_s17 }
  0x10   :  { %p29_p10 = por %p28_p9, %p27_p8 }
  0x12   :  { %p30_p11 = pnand %p29_p10, %p23_p7 }
  0x14   :  { %33 = shalt.err (!%p30_p11)  }
  0x15   :  { %7 = dma.hbm_to_vmem [thread:$0]  %s2_s8, 128, %s5_s11, [#allocation0] }
  0x16   :  { %35 = dma.done.wait [#allocation0], 128  }
  0x17   :  { %36 = vsyncadd [#allocation0], 4294967168 }
  0x18   :  { %9 = vsyncpa [#allocation0], 1 }

// kernel: reverse.3
= control target key start
LH: loop header
LB: loop body
LE: loop exit
PB: predicated region body
PF: predicated region fallthrough
CT: control target
= control target key end

     0   :  { %v2_v0 = vlaneseq  ;;  %s454_s0 = inlined_call_operand.vmem [shape: f32[2,32,256], index: 0, kind: input, shape index: {}]   ;;  %s455_s1 = inlined_call_operand.vmem [shape: f32[2,32,256], index: 1, kind: output, shape index: {}]  }
   0x2   :  { %v408_v1 = vsub.s32 127, %v2_v0 }
   0x4   :  { %4 = vset.pattern.permute.xlu0 %v408_v1 }
   0x5   :  { %s411_s6 = smov 0   ;;  %s413_s7 = smov 0  }
   0x6   :  { %s415_s8 = smov 0  }
   0x7 LB: > { %s323_s9 = sadd.s32 4294967295, %s396_s8   ;;  %s22_s10 = sadd.s32 1, %s392_s7  ;;  %s396_s8 = sphi %s415_s8, %s10_s8   ;;  %s392_s7 = sphi %s413_s7, %s457_s7   ;;  %s388_s6 = sphi %s411_s6, %s456_s6  }
   0x8   : > { %p23_p0 = scmp.ge.s32.totalorder %s22_s10, 2  ;;  %p325_p1 = scmp.ge.s32.totalorder %s396_s8, 2 }
   0x9   : > { %s45_s11 = sand.u32 (!%p325_p1), 1, %s396_s8   ;;  %s48_s12 = ssub.s32 (!%p325_p1), 1, %s392_s7 }
   0xa   : > { %s459_s10 = smov (%p23_p0, %s22_s10), 0  ;;  %43 = sbr.rel (%p325_p1) target bundleno = 18 (0x12), region = 16 }
   0xb   : > { %s326_s13 = sshll.u32 (!%p325_p1), %s45_s11, 6  ;;  %s327_s14 = sshll.u32 (!%p325_p1), %s48_s12, 3 }
   0xc   : > { %s56_s17 = scalar_lea.vmem (!%p325_p1), %s454_s0, %s327_s14  ;;  %s47_s18 = scalar_lea.vmem (!%p325_p1), [#allocation0], %s326_s13 }
   0xd   : > { %v98_v2 = vld [vmem:[%s56_s17] sm:$0xff] (!%p325_p1)  ;;  %v100_v3 = vld [vmem:[%s56_s17 + $0x10] sm:$0xff] (!%p325_p1) }
   0xe   : > { %v102_v4 = vld [vmem:[%s56_s17 + $0x20] sm:$0xff] (!%p325_p1)  ;;  %99 = vst [vmem:[%s47_s18] sm:$0xff] (!%p325_p1), %v98_v2  ;;  %101 = vst [vmem:[%s47_s18 + $0x8] sm:$0xff] (!%p325_p1), %v100_v3  ;;  %v104_v5 = vld [vmem:[%s56_s17 + $0x30] sm:$0xff] (!%p325_p1) }
   0xf   : > { %103 = vst [vmem:[%s47_s18 + $0x10] sm:$0xff] (!%p325_p1), %v102_v4  ;;  %v106_v6 = vld [vmem:[%s56_s17 + $0x40] sm:$0xff] (!%p325_p1)  ;;  %v108_v7 = vld [vmem:[%s56_s17 + $0x50] sm:$0xff] (!%p325_p1)  ;;  %105 = vst [vmem:[%s47_s18 + $0x18] sm:$0xff] (!%p325_p1), %v104_v5 }
  0x10   : > { %107 = vst [vmem:[%s47_s18 + $0x20] sm:$0xff] (!%p325_p1), %v106_v6  ;;  %109 = vst [vmem:[%s47_s18 + $0x28] sm:$0xff] (!%p325_p1), %v108_v7  ;;  %v110_v8 = vld [vmem:[%s56_s17 + $0x60] sm:$0xff] (!%p325_p1)  ;;  %v112_v9 = vld [vmem:[%s56_s17 + $0x70] sm:$0xff] (!%p325_p1) }
  0x11   : > { %111 = vst [vmem:[%s47_s18 + $0x30] sm:$0xff] %v110_v8  ;;  %113 = vst [vmem:[%s47_s18 + $0x38] sm:$0xff] %v112_v9 }
  0x12 PF: > { %p328_p2 = scmp.ge.s32.totalorder %s396_s8, 1  ;;  %p118_p3 = scmp.lt.s32.totalorder %s396_s8, 3 }
  0x14   : > { %p119_p4 = pnand %p328_p2, %p118_p3 }
  0x15   : > { %373 = vset.pattern.permute.xlu1 (!%p119_p4), %v408_v1  ;;  %s125_s19 = sand.u32 (!%p119_p4), 1, %s323_s9   ;;  %s346_s22 = sshll.u32 (!%p119_p4), %s388_s6, 3 }
  0x16   : > { %122 = sbr.rel (%p119_p4) target bundleno = 166 (0xa6), region = 54  ;;  %s329_s20 = sshll.u32 (!%p119_p4), %s125_s19, 6 }
  0x17   : > { %s127_s21 = scalar_lea.vmem (!%p119_p4), [#allocation0], %s329_s20  ;;  %s198_s25 = scalar_lea.vmem (!%p119_p4), %s455_s1, %s346_s22 }
  0x18   : > { %v333_v10 = vld [vmem:[%s127_s21 + $0x10] sm:$0xff] (!%p119_p4)  ;;  %v141_v11 = vld [vmem:[%s127_s21] sm:$0xff] (!%p119_p4)  ;;  %v335_v12 = vld [vmem:[%s127_s21 + $0x18] sm:$0xff] (!%p119_p4) }
  0x19   : > { %154 = vperm.xlu1 (!%p119_p4), %373, %v333_v10   ;;  %142 = vperm.xlu0 (!%p119_p4), %4, %v141_v11   ;;  %v331_v13 = vld [vmem:[%s127_s21 + $0x8] sm:$0xff] (!%p119_p4)  ;;  %v337_v15 = vld [vmem:[%s127_s21 + $0x20] sm:$0xff] (!%p119_p4)  ;;  %v343_v16 = vld [vmem:[%s127_s21 + $0x38] sm:$0xff] (!%p119_p4) }
  0x1a   : > { %v339_v14 = vld [vmem:[%s127_s21 + $0x28] sm:$0xff] (!%p119_p4)  ;;  %v341_v17 = vld [vmem:[%s127_s21 + $0x30] sm:$0xff] (!%p119_p4) }
  0x1d   : > { %160 = vperm.xlu1 %373, %v335_v12   ;;  %148 = vperm.xlu0 %4, %v331_v13  }
  0x21   : > { %172 = vperm.xlu1 %373, %v339_v14   ;;  %166 = vperm.xlu0 %4, %v337_v15  }
  0x25   : > { %184 = vperm.xlu1 %373, %v343_v16   ;;  %178 = vperm.xlu0 %4, %v341_v17  }
  0x98   : > { %v155_v18 = vpop.permute.xlu1 %154  ;;  %v143_v19 = vpop.permute.xlu0 %142 }
  0x99   : > { %245 = vst [vmem:[%s198_s25 + $0x20] sm:$0xff] %v155_v18  ;;  %241 = vst [vmem:[%s198_s25] sm:$0xff] %v143_v19 }
  0x9c   : > { %v161_v20 = vpop.permute.xlu1 %160  ;;  %v149_v21 = vpop.permute.xlu0 %148 }
  0x9d   : > { %247 = vst [vmem:[%s198_s25 + $0x30] sm:$0xff] %v161_v20  ;;  %243 = vst [vmem:[%s198_s25 + $0x10] sm:$0xff] %v149_v21 }
  0xa0   : > { %v173_v22 = vpop.permute.xlu1 %172  ;;  %v167_v23 = vpop.permute.xlu0 %166 }
  0xa1   : > { %251 = vst [vmem:[%s198_s25 + $0x50] sm:$0xff] %v173_v22  ;;  %249 = vst [vmem:[%s198_s25 + $0x40] sm:$0xff] %v167_v23 }
  0xa4   : > { %v185_v24 = vpop.permute.xlu1 %184  ;;  %v179_v25 = vpop.permute.xlu0 %178 }
  0xa5   : > { %255 = vst [vmem:[%s198_s25 + $0x70] sm:$0xff] %v185_v24  ;;  %253 = vst [vmem:[%s198_s25 + $0x60] sm:$0xff] %v179_v25 }
  0xa6 PF: > { %s10_s8 = sadd.s32 1, %s396_s8   ;;  %s456_s6 = smov %s392_s7 }
  0xa7   : > { %p7_p5 = scmp.ge.s32.totalorder %s10_s8, 4   ;;  %s457_s7 = smov %s459_s10 }
  0xa9   :  { %9 = sbr.rel (!%p7_p5) target bundleno = 7 (0x7), region = 132 }

// kernel: s4block_forward.1
= control target key start
LH: loop header
LB: loop body
LE: loop exit
PB: predicated region body
PF: predicated region fallthrough
CT: control target
= control target key end

     0   :  { %10 = vsyncpa [#allocation4], 0  ;;  %s1465_s0 = inlined_call_operand.vmem [shape: f32[2,32,512], index: 0, kind: input, shape index: {}]   ;;  %s1466_s1 = inlined_call_operand.vmem [shape: f32[2,32,256], index: 1, kind: input, shape index: {}]   ;;  %s1467_s2 = inlined_call_operand.vmem [shape: f32[32,1], index: 2, kind: input, shape index: {}]   ;;  %s1468_s3 = inlined_call_operand.vmem [shape: bf16[64,32], index: 3, kind: input, shape index: {}]   ;;  %s1469_s4 = inlined_call_operand.vmem [shape: f32[64,1], index: 4, kind: input, shape index: {}]   ;;  %s1470_s5 = inlined_call_operand.hbm [shape: f32[2,32,256], index: 5, kind: output, shape index: {}]  }
   0x1   :  { %12 = vsyncpa [#allocation4 + $0x1], 0  ;;  %s1142_s18 = smov 0   ;;  %s1144_s19 = smov 0  }
   0x2   :  { %s1146_s20 = smov 0   ;;  %s1148_s21 = smov 0  }
   0x3   :  { %s1150_s22 = smov 0   ;;  %s1152_s23 = smov 0  }
   0x4 LB: > { %s860_s24 = sadd.s32 4294967295, %s1106_s23   ;;  %s861_s25 = sadd.s32 4294967294, %s1106_s23   ;;  %s1106_s23 = sphi %s1152_s23, %s18_s23   ;;  %s1102_s22 = sphi %s1150_s22, %s1477_s22   ;;  %s1098_s21 = sphi %s1148_s21, %s1476_s21   ;;  %s1094_s20 = sphi %s1146_s20, %s1475_s20   ;;  %s1090_s19 = sphi %s1144_s19, %s1474_s19   ;;  %s1086_s18 = sphi %s1142_s18, %s1473_s18  }
   0x5   : > { %s30_s26 = sadd.s32 1, %s1102_s22  ;;  %s39_s27 = sadd.s32 1, %s1094_s20 }
   0x6   : > { %p32_p0 = scmp.ge.s32.totalorder %s30_s26, 2  ;;  %p46_p1 = scmp.ne.s32.totalorder %s1094_s20, %s1090_s19 }
   0x7   : > { %p47_p2 = scmp.eq.s32.totalorder %s1106_s23, 0  ;;  %p169_p3 = scmp.eq.s32.totalorder %s860_s24, 1 }
   0x8   : > { %s1479_s26 = smov (%p32_p0, %s30_s26), 0  ;;  %p174_p6 = scmp.ne.s32.totalorder %s1090_s19, %s1086_s18 }
   0x9   : > { %p48_p4 = por %p47_p2, %p46_p1  ;;  %p1181_p5 = por %p169_p3, %p46_p1 }
   0xa   : > { %s34_s29 = ssub.s32 %s1102_s22, %s1479_s26  ;;  %p175_p8 = scmp.eq.s32.totalorder %s861_s25, 1 }
   0xb   : > { %p37_p7 = scmp.eq.s32.totalorder %s34_s29, 0  ;;  %p863_p10 = scmp.ge.s32.totalorder %s1106_s23, 2 }
   0xc   : > { %p1192_p9 = por %p175_p8, %p174_p6 }
   0xd   : > { %s1190_s30 = scalar_select %p37_p7, %s1094_s20, %s39_s27  }
   0xe   : > { %200 = sbr.rel (%p863_p10) target bundleno = 29 (0x1d), region = 28 }
  0x15   : > { %203 = sbr.rel (!%p48_p4) target bundleno = 29 (0x1d), region = 32  ;;  %s205_s7 = sand.u32 (%p48_p4), 1, %s1094_s20  }
  0x16   : > { %s893_s8 = sshll.u32 (%p48_p4), %s1102_s22, 7  ;;  %s864_s9 = sshll.u32 (%p48_p4), %s205_s7, 6 }
  0x17   : > { %s212_s12 = scalar_lea.vmem (%p48_p4), %s1465_s0, %s893_s8  ;;  %s207_s13 = scalar_lea.vmem (%p48_p4), [#allocation2], %s864_s9 }
  0x18   : > { %v225_v0 = vld [vmem:[%s212_s12] sm:$0xff] (%p48_p4)  ;;  %v227_v1 = vld [vmem:[%s212_s12 + $0x8] sm:$0xff] (%p48_p4) }
  0x19   : > { %v229_v2 = vld [vmem:[%s212_s12 + $0x20] sm:$0xff] (%p48_p4)  ;;  %226 = vst [vmem:[%s207_s13] sm:$0xff] (%p48_p4), %v225_v0  ;;  %228 = vst [vmem:[%s207_s13 + $0x8] sm:$0xff] (%p48_p4), %v227_v1  ;;  %v231_v3 = vld [vmem:[%s212_s12 + $0x28] sm:$0xff] (%p48_p4) }
  0x1a   : > { %230 = vst [vmem:[%s207_s13 + $0x10] sm:$0xff] (%p48_p4), %v229_v2  ;;  %v233_v4 = vld [vmem:[%s212_s12 + $0x40] sm:$0xff] (%p48_p4)  ;;  %v235_v5 = vld [vmem:[%s212_s12 + $0x48] sm:$0xff] (%p48_p4)  ;;  %232 = vst [vmem:[%s207_s13 + $0x18] sm:$0xff] (%p48_p4), %v231_v3 }
  0x1b   : > { %234 = vst [vmem:[%s207_s13 + $0x20] sm:$0xff] (%p48_p4), %v233_v4  ;;  %236 = vst [vmem:[%s207_s13 + $0x28] sm:$0xff] (%p48_p4), %v235_v5  ;;  %v237_v6 = vld [vmem:[%s212_s12 + $0x60] sm:$0xff] (%p48_p4)  ;;  %v239_v7 = vld [vmem:[%s212_s12 + $0x68] sm:$0xff] (%p48_p4) }
  0x1c   : > { %238 = vst [vmem:[%s207_s13 + $0x30] sm:$0xff] %v237_v6  ;;  %240 = vst [vmem:[%s207_s13 + $0x38] sm:$0xff] %v239_v7 }
  0x1d PF: > { %p867_p11 = scmp.ge.s32.totalorder %s1106_s23, 1  ;;  %p258_p12 = scmp.lt.s32.totalorder %s1106_s23, 3 }
  0x1f   : > { %p259_p13 = pnand %p867_p11, %p258_p12 }
  0x20   : > { %v324_v8 = vld [vmem:[%s1467_s2 + $0x10] sm:$0xff] (!%p259_p13)  ;;  %v322_v9 = vld [vmem:[%s1467_s2] sm:$0xff] (!%p259_p13)  ;;  %v1108_v10 = vmov (!%p259_p13), 0   ;;  %v325_v11 = vld [vmem:[%s1467_s2 + $0x18] sm:$0xff] (!%p259_p13)  ;;  %p303_p0 = scmp.lt.s32.totalorder (!%p259_p13), %s1098_s21, 1  ;;  %s265_s9 = sand.u32 (!%p259_p13), 1, %s1090_s19  }
  0x21   : > { %262 = sbr.rel (%p259_p13) target bundleno = 506 (0x1fa), region = 59  ;;  %959 = vset.pattern.permute.xlu1 (!%p259_p13), %v1108_v10  ;;  %958 = vset.pattern.permute.xlu0 (!%p259_p13), %v1108_v10  ;;  %v323_v12 = vld [vmem:[%s1467_s2 + $0x8] sm:$0xff] (!%p259_p13)  ;;  %v530_v14 = vld [vmem:[%s1469_s4 + $0x20] sm:$0xff] (!%p259_p13)  ;;  %v533_v15 = vld [vmem:[%s1469_s4 + $0x38] sm:$0xff] (!%p259_p13)  ;;  %s1251_s11 = sshll.u32 (!%p259_p13), %s265_s9, 6  ;;  %vm594_vm0 = vcmask (!%p259_p13), 261120  }
  0x22   : > { %346 = vperm.xlu1 (!%p259_p13), %959, %v324_v8   ;;  %336 = vperm.xlu0 (!%p259_p13), %958, %v322_v9   ;;  %v531_v13 = vld [vmem:[%s1469_s4 + $0x28] sm:$0xff] (!%p259_p13)  ;;  %v532_v16 = vld [vmem:[%s1469_s4 + $0x30] sm:$0xff] (!%p259_p13)  ;;  %v526_v18 = vld [vmem:[%s1469_s4] sm:$0xff] (!%p259_p13)  ;;  %s267_s15 = scalar_lea.vmem (!%p259_p13), [#allocation2], %s1251_s11  ;;  %s895_s12 = sshll.u32 (!%p259_p13), %s1098_s21, 10 }
  0x23   : > { %639 = vmatprep.mubr.bf16.mxu0 (!%p259_p13), %v1108_v10  ;;  %659 = vmatprep.mubr.bf16.mxu1 (!%p259_p13), %v1108_v10  ;;  %v527_v17 = vld [vmem:[%s1469_s4 + $0x8] sm:$0xff] (!%p259_p13)  ;;  %v529_v19 = vld [vmem:[%s1469_s4 + $0x18] sm:$0xff] (!%p259_p13)  ;;  %v528_v20 = vld [vmem:[%s1469_s4 + $0x10] sm:$0xff] (!%p259_p13)  ;;  %s1109_s17 = smov (!%p259_p13), [#allocation3]  }
  0x24   : > { %v318_v25 = vld [vmem:[%s267_s15 + $0x20] sm:$0xff] (!%p259_p13)  ;;  %v319_v27 = vld [vmem:[%s267_s15 + $0x28] sm:$0xff] (!%p259_p13)  ;;  %v320_v44 = vld [vmem:[%s267_s15 + $0x30] sm:$0xff] (!%p259_p13)  ;;  %s1032_s24 = sshll.u32 (!%p259_p13), %s1109_s17, 4  ;;  %s1033_s24 = int_to_ptr.vmem [resolvable:$false] %s1032_s24 }
  0x25   : > { %v314_v29 = vld [vmem:[%s267_s15] sm:$0xff] (!%p259_p13)  ;;  %v315_v30 = vld [vmem:[%s267_s15 + $0x8] sm:$0xff] (!%p259_p13)  ;;  %v321_v50 = vld [vmem:[%s267_s15 + $0x38] sm:$0xff] (!%p259_p13)  ;;  %s1034_s25 = scalar_lea.vmem (!%p259_p13), %s1033_s24, 2048 }
  0x26   : > { %351 = vperm.xlu1 (!%p259_p13), %959, %v325_v11   ;;  %341 = vperm.xlu0 (!%p259_p13), %958, %v323_v12   ;;  %v316_v51 = vld [vmem:[%s267_s15 + $0x10] sm:$0xff] (!%p259_p13)  ;;  %v317_v52 = vld [vmem:[%s267_s15 + $0x18] sm:$0xff] (!%p259_p13)  ;;  %s1412_s15 = scalar_lea.hbm (!%p259_p13), %s1470_s5, %s895_s12 }
  0x28   : > { %s304_s8 = scalar_select %p303_p0, %s1098_s21, 1 }
  0x29   : > { %s1418_s21 = scalar_lea.sflag [#allocation4], %s265_s9 }
  0x2a   : > { %561 = vperm.xlu1 %959, %v531_v13   ;;  %556 = vperm.xlu0 %958, %v530_v14   ;;  %s894_s10 = sshll.u32 %s304_s8, 6 }
  0x2b   : > { %s310_s14 = scalar_lea.vmem %s1466_s1, %s894_s10  ;;  %s300_s10 = scalar_lea.vmem [#allocation3], %s1251_s11 }
  0x2c   : > { %v330_v21 = vld [vmem:[%s310_s14 + $0x20] sm:$0xff]  ;;  %v331_v22 = vld [vmem:[%s310_s14 + $0x28] sm:$0xff]  ;;  %v332_v35 = vld [vmem:[%s310_s14 + $0x30] sm:$0xff]  ;;  %s760_s13 = sshll.u32 %s300_s10, 4  ;;  %s1414_s13 = int_to_ptr.vmem [resolvable:$true] %s760_s13 }
  0x2d   : > { %v326_v23 = vld [vmem:[%s310_s14] sm:$0xff]  ;;  %v327_v24 = vld [vmem:[%s310_s14 + $0x8] sm:$0xff]  ;;  %v333_v40 = vld [vmem:[%s310_s14 + $0x38] sm:$0xff]  ;;  %s1028_s16 = scalar_lea.vmem %s1414_s13, 1024  ;;  %p1035_p4 = scmp.lt.s32.totalorder %s1414_s13, %s1033_s24 }
  0x2e   : > { %571 = vperm.xlu1 %959, %v533_v15   ;;  %566 = vperm.xlu0 %958, %v532_v16   ;;  %v328_v41 = vld [vmem:[%s310_s14 + $0x10] sm:$0xff]  ;;  %v329_v42 = vld [vmem:[%s310_s14 + $0x18] sm:$0xff]  ;;  %p1029_p1 = scmp.ne.s32.totalorder %s1414_s13, %s1028_s16  ;;  %p1036_p6 = scmp.lt.s32.totalorder %s1034_s25, %s1028_s16 }
  0x30   : > { %p1030_p2 = pnand %p1029_p1, %p1181_p5  ;;  %p1037_p7 = por %p1036_p6, %p1035_p4 }
  0x32   : > { %541 = vperm.xlu1 %959, %v527_v17   ;;  %536 = vperm.xlu0 %958, %v526_v18   ;;  %p1031_p3 = pneg %p1030_p2 }
  0x34   : > { %p1038_p8 = pnand %p1037_p7, %p1031_p3 }
  0x36   : > { %551 = vperm.xlu1 %959, %v529_v19   ;;  %546 = vperm.xlu0 %958, %v528_v20  }
  0xa1   : > { %v347_v26 = vpop.permute.xlu1 %346  ;;  %v337_v28 = vpop.permute.xlu0 %336 }
  0xa2   : > { %v358_v31 = vmul.f32 %v347_v26, %v330_v21  ;;  %v359_v32 = vmul.f32 %v347_v26, %v331_v22  ;;  %v354_v33 = vmul.f32 %v337_v28, %v326_v23  ;;  %v355_v34 = vmul.f32 %v337_v28, %v327_v24 }
  0xa4   : > { %v1257_v36 = vadd.f32 %v358_v31, %v318_v25  ;;  %v1259_v37 = vadd.f32 %v359_v32, %v319_v27  ;;  %v1261_v38 = vadd.f32 %v354_v33, %v314_v29  ;;  %v1263_v39 = vadd.f32 %v355_v34, %v315_v30 }
  0xa5   : > { %v352_v43 = vpop.permute.xlu1 %351  ;;  %v342_v45 = vpop.permute.xlu0 %341 }
  0xa6   : > { %v374_v46 = vmul.f32 %v1257_v36, %v1257_v36  ;;  %v375_v47 = vmul.f32 %v1259_v37, %v1259_v37  ;;  %v370_v48 = vmul.f32 %v1261_v38, %v1261_v38  ;;  %v371_v49 = vmul.f32 %v1263_v39, %v1263_v39 }
  0xa7   : > { %v360_v53 = vmul.f32 %v352_v43, %v332_v35  ;;  %v361_v54 = vmul.f32 %v352_v43, %v333_v40  ;;  %v356_v55 = vmul.f32 %v342_v45, %v328_v41  ;;  %v357_v56 = vmul.f32 %v342_v45, %v329_v42 }
  0xa8   : > { %v382_v57 = vmul.f32 %v374_v46, %v1257_v36  ;;  %v383_v58 = vmul.f32 %v375_v47, %v1259_v37  ;;  %v378_v59 = vmul.f32 %v370_v48, %v1261_v38  ;;  %v379_v60 = vmul.f32 %v371_v49, %v1263_v39 }
  0xa9   : > { %v1277_v61 = vadd.f32 %v360_v53, %v320_v44  ;;  %v1279_v62 = vadd.f32 %v361_v54, %v321_v50  ;;  %v1281_v63 = vadd.f32 %v356_v55, %v316_v51  ;;  %v1283_v0 = vadd.f32 %v357_v56, %v317_v52 }
  0xaa   : > { %v390_v1 = vmul.f32 0.044715, %v382_v57  ;;  %v391_v2 = vmul.f32 0.044715, %v383_v58  ;;  %v386_v3 = vmul.f32 0.044715, %v378_v59 }
  0xab   : > { %v387_v4 = vmul.f32 0.044715, %v379_v60  ;;  %v376_v5 = vmul.f32 %v1277_v61, %v1277_v61  ;;  %v377_v6 = vmul.f32 %v1279_v62, %v1279_v62  ;;  %v372_v7 = vmul.f32 %v1281_v63, %v1281_v63 }
  0xac   : > { %v398_v8 = vadd.f32 %v390_v1, %v1257_v36  ;;  %v399_v9 = vadd.f32 %v391_v2, %v1259_v37  ;;  %v394_v11 = vadd.f32 %v386_v3, %v1261_v38  ;;  %v373_v12 = vmul.f32 %v1283_v0, %v1283_v0 }
  0xad   : > { %v395_v13 = vadd.f32 %v387_v4, %v1263_v39  ;;  %v384_v14 = vmul.f32 %v376_v5, %v1277_v61  ;;  %v385_v15 = vmul.f32 %v377_v6, %v1279_v62  ;;  %v380_v16 = vmul.f32 %v372_v7, %v1281_v63 }
  0xae   : > { %v406_v17 = vmul.f32 0.7978846, %v398_v8  ;;  %v407_v18 = vmul.f32 0.7978846, %v399_v9  ;;  %v402_v19 = vmul.f32 0.7978846, %v394_v11  ;;  %v381_v20 = vmul.f32 %v373_v12, %v1283_v0 }
  0xaf   : > { %v403_v21 = vmul.f32 0.7978846, %v395_v13  ;;  %v392_v22 = vmul.f32 0.044715, %v384_v14  ;;  %v393_v23 = vmul.f32 0.044715, %v385_v15 }
  0xb0   : > { %964 = vtanh.f32 %v406_v17  ;;  %v388_v24 = vmul.f32 0.044715, %v380_v16  ;;  %v389_v25 = vmul.f32 0.044715, %v381_v20 }
  0xb1   : > { %966 = vtanh.f32 %v407_v18  ;;  %v400_v26 = vadd.f32 %v392_v22, %v1277_v61  ;;  %v401_v27 = vadd.f32 %v393_v23, %v1279_v62 }
  0xb2   : > { %968 = vtanh.f32 %v402_v19  ;;  %v396_v28 = vadd.f32 %v388_v24, %v1281_v63  ;;  %v397_v29 = vadd.f32 %v389_v25, %v1283_v0 }
  0xb3   : > { %970 = vtanh.f32 %v403_v21  ;;  %v408_v30 = vmul.f32 0.7978846, %v400_v26  ;;  %v409_v31 = vmul.f32 0.7978846, %v401_v27 }
  0xb4   : > { %v404_v32 = vmul.f32 0.7978846, %v396_v28  ;;  %v405_v33 = vmul.f32 0.7978846, %v397_v29 }
  0xb5   : > { %972 = vtanh.f32 %v408_v30 }
  0xb6   : > { %974 = vtanh.f32 %v409_v31 }
  0xb7   : > { %976 = vtanh.f32 %v404_v32 }
  0xb8   : > { %978 = vtanh.f32 %v405_v33 }
  0xba   : > { %v965_v34 = vpop.eup %964 }
  0xbb   : > { %v967_v35 = vpop.eup %966  ;;  %v422_v40 = vadd.f32 1.0, %v965_v34 }
  0xbc   : > { %v969_v41 = vpop.eup %968  ;;  %v423_v42 = vadd.f32 1.0, %v967_v35 }
  0xbd   : > { %v971_v43 = vpop.eup %970  ;;  %v430_v44 = vmul.f32 0.5, %v422_v40  ;;  %v418_v45 = vadd.f32 1.0, %v969_v41 }
  0xbe   : > { %v431_v46 = vmul.f32 0.5, %v423_v42  ;;  %v419_v47 = vadd.f32 1.0, %v971_v43 }
  0xbf   : > { %v973_v48 = vpop.eup %972  ;;  %v1306_v49 = vmul.f32 %v430_v44, %v1257_v36  ;;  %v426_v50 = vmul.f32 0.5, %v418_v45 }
  0xc0   : > { %v975_v51 = vpop.eup %974  ;;  %v1309_v52 = vmul.f32 %v431_v46, %v1259_v37  ;;  %v424_v53 = vadd.f32 1.0, %v973_v48  ;;  %v427_v54 = vmul.f32 0.5, %v419_v47 }
  0xc1   : > { %v977_v55 = vpop.eup %976  ;;  %v425_v56 = vadd.f32 1.0, %v975_v51  ;;  %v1312_v57 = vmul.f32 %v426_v50, %v1261_v38  ;;  %v446_v58 = vmul.f32 %v1306_v49, %v1306_v49 }
  0xc2   : > { %v979_v59 = vpop.eup %978  ;;  %v432_v60 = vmul.f32 0.5, %v424_v53  ;;  %v1317_v36 = vmul.f32 %v427_v54, %v1263_v39  ;;  %v420_v1 = vadd.f32 1.0, %v977_v55  ;;  %v447_v37 = vmul.f32 %v1309_v52, %v1309_v52 }
  0xc3   : > { %v433_v2 = vmul.f32 0.5, %v425_v56  ;;  %v421_v3 = vadd.f32 1.0, %v979_v59  ;;  %v442_v4 = vmul.f32 %v1312_v57, %v1312_v57  ;;  %v454_v38 = vmul.f32 %v446_v58, %v1306_v49 }
  0xc4   : > { %v1325_v5 = vmul.f32 %v432_v60, %v1277_v61  ;;  %v443_v6 = vmul.f32 %v1317_v36, %v1317_v36  ;;  %v428_v7 = vmul.f32 0.5, %v420_v1  ;;  %v455_v39 = vmul.f32 %v447_v37, %v1309_v52 }
  0xc5   : > { %v1331_v8 = vmul.f32 %v433_v2, %v1279_v62  ;;  %v429_v9 = vmul.f32 0.5, %v421_v3  ;;  %v450_v11 = vmul.f32 %v442_v4, %v1312_v57  ;;  %v462_v12 = vmul.f32 0.044715, %v454_v38 }
  0xc6   : > { %v451_v13 = vmul.f32 %v443_v6, %v1317_v36  ;;  %v1336_v14 = vmul.f32 %v428_v7, %v1281_v63  ;;  %v463_v61 = vmul.f32 0.044715, %v455_v39  ;;  %v448_v15 = vmul.f32 %v1325_v5, %v1325_v5 }
  0xc7   : > { %v1341_v16 = vmul.f32 %v429_v9, %v1283_v0  ;;  %v458_v17 = vmul.f32 0.044715, %v450_v11  ;;  %v449_v62 = vmul.f32 %v1331_v8, %v1331_v8  ;;  %v470_v18 = vadd.f32 %v462_v12, %v1306_v49 }
  0xc8   : > { %v459_v19 = vmul.f32 0.044715, %v451_v13  ;;  %v444_v20 = vmul.f32 %v1336_v14, %v1336_v14  ;;  %v471_v63 = vadd.f32 %v463_v61, %v1309_v52  ;;  %v456_v21 = vmul.f32 %v448_v15, %v1325_v5 }
  0xc9   : > { %v445_v22 = vmul.f32 %v1341_v16, %v1341_v16  ;;  %v466_v0 = vadd.f32 %v458_v17, %v1312_v57  ;;  %v457_v23 = vmul.f32 %v449_v62, %v1331_v8  ;;  %v478_v24 = vmul.f32 0.7978846, %v470_v18 }
  0xca   : > { %v467_v25 = vadd.f32 %v459_v19, %v1317_v36  ;;  %v452_v26 = vmul.f32 %v444_v20, %v1336_v14  ;;  %v464_v27 = vmul.f32 0.044715, %v456_v21  ;;  %v479_v31 = vmul.f32 0.7978846, %v471_v63 }
  0xcb   : > { %v453_v28 = vmul.f32 %v445_v22, %v1341_v16  ;;  %v474_v29 = vmul.f32 0.7978846, %v466_v0  ;;  %v465_v30 = vmul.f32 0.044715, %v457_v23  ;;  %980 = vtanh.f32 %v478_v24 }
  0xcc   : > { %v475_v32 = vmul.f32 0.7978846, %v467_v25  ;;  %v460_v33 = vmul.f32 0.044715, %v452_v26  ;;  %v472_v34 = vadd.f32 %v464_v27, %v1325_v5 }
  0xcd   : > { %v461_v35 = vmul.f32 0.044715, %v453_v28  ;;  %982 = vtanh.f32 %v474_v29  ;;  %v473_v40 = vadd.f32 %v465_v30, %v1331_v8 }
  0xce   : > { %984 = vtanh.f32 %v475_v32  ;;  %v468_v41 = vadd.f32 %v460_v33, %v1336_v14  ;;  %v480_v42 = vmul.f32 0.7978846, %v472_v34 }
  0xcf   : > { %v469_v43 = vadd.f32 %v461_v35, %v1341_v16  ;;  %v481_v44 = vmul.f32 0.7978846, %v473_v40  ;;  %986 = vtanh.f32 %v479_v31 }
  0xd0   : > { %v476_v45 = vmul.f32 0.7978846, %v468_v41  ;;  %988 = vtanh.f32 %v480_v42 }
  0xd1   : > { %v477_v46 = vmul.f32 0.7978846, %v469_v43  ;;  %990 = vtanh.f32 %v481_v44 }
  0xd2   : > { %992 = vtanh.f32 %v476_v45 }
  0xd3   : > { %994 = vtanh.f32 %v477_v46 }
  0xd5   : > { %v981_v47 = vpop.eup %980 }
  0xd6   : > { %v494_v39 = vadd.f32 1.0, %v981_v47 }
  0xd7   : > { %v983_v48 = vpop.eup %982 }
  0xd8   : > { %v985_v50 = vpop.eup %984  ;;  %v490_v53 = vadd.f32 1.0, %v983_v48  ;;  %v502_v19 = vmul.f32 0.5, %v494_v39 }
  0xd9   : > { %v987_v51 = vpop.eup %986  ;;  %v491_v55 = vadd.f32 1.0, %v985_v50 }
  0xda   : > { %v989_v54 = vpop.eup %988  ;;  %v495_v59 = vadd.f32 1.0, %v987_v51  ;;  %v498_v2 = vmul.f32 0.5, %v490_v53 }
  0xdb   : > { %v991_v56 = vpop.eup %990  ;;  %v496_v3 = vadd.f32 1.0, %v989_v54  ;;  %v499_v38 = vmul.f32 0.5, %v491_v55 }
  0xdc   : > { %v993_v58 = vpop.eup %992  ;;  %v497_v60 = vadd.f32 1.0, %v991_v56  ;;  %v503_v11 = vmul.f32 0.5, %v495_v59  ;;  %v506_v12 = vmul.f32 %v498_v2, %v1312_v57  ;;  %v510_v57 = vmul.f32 %v502_v19, %v1306_v49  ;;  %v962_v49 = vld [vmem:[%s1468_s3 + $0x8] sm:$0xff]  }
  0xdd   : > { %v995_v1 = vpop.eup %994  ;;  %v492_v37 = vadd.f32 1.0, %v993_v58  ;;  %v504_v61 = vmul.f32 0.5, %v496_v3  ;;  %v507_v15 = vmul.f32 %v499_v38, %v1317_v36 }
  0xde   : > { %v493_v4 = vadd.f32 1.0, %v995_v1  ;;  %v505_v6 = vmul.f32 0.5, %v497_v60  ;;  %v511_v63 = vmul.f32 %v503_v11, %v1309_v52  ;;  %v961_v52 = vld [vmem:[%s1468_s3 + $0x10] sm:$0xff]  }
  0xdf   : > { %v500_v7 = vmul.f32 0.5, %v492_v37  ;;  %v512_v21 = vmul.f32 %v504_v61, %v1325_v5  ;;  %v963_v5 = vld [vmem:[%s1468_s3 + $0x18] sm:$0xff]  }
  0xe0   : > { %v501_v9 = vmul.f32 0.5, %v493_v4  ;;  %v513_v62 = vmul.f32 %v505_v6, %v1331_v8  ;;  %v960_v8 = vld [vmem:[%s1468_s3] sm:$0xff]  }
  0xe1   : > { %v508_v13 = vmul.f32 %v500_v7, %v1336_v14  ;;  %v524_v36 = vpack.c.bf16 %v512_v21, %v510_v57  ;;  %v562_v14 = vpop.permute.xlu1 %561 }
  0xe2   : > { %v509_v17 = vmul.f32 %v501_v9, %v1341_v16  ;;  %v525_v22 = vpack.c.bf16 %v513_v62, %v511_v63  ;;  %v557_v16 = vpop.permute.xlu0 %556 }
  0xe3   : > { %v522_v18 = vpack.c.bf16 %v508_v13, %v506_v12 }
  0xe4   : > { %v523_v20 = vpack.c.bf16 %v509_v17, %v507_v15 }
  0xe5   : > { %v572_v41 = vpop.permute.xlu1 %571 }
  0xe6   : > { %607 = vmatprep.subr.bf16.mxu0 %v523_v20  ;;  %896 = vmatprep.subr.bf16.mxu1 %v523_v20  ;;  %v567_v42 = vpop.permute.xlu0 %566 }
  0xe7   : > { %608 = vmatpush1.bf16.msra.mxu0 %v522_v18  ;;  %898 = vmatpush1.bf16.msra.mxu1 %v522_v18 }
  0xe8   : > { %609 = vmatprep.subr.bf16.mxu0 %v525_v22  ;;  %897 = vmatprep.subr.bf16.mxu1 %v525_v22 }
  0xe9   : > { %v542_v63 = vpop.permute.xlu1 %541 }
  0xea   : > { %v537_v17 = vpop.permute.xlu0 %536 }
  0xeb   : > { %610 = vmatpush1.bf16.msra.mxu0 %v524_v36  ;;  %899 = vmatpush1.bf16.msra.mxu1 %v524_v36 }
  0xee   : > { %876 = vmatmul.mubr.msk.bf16.vlgmr.msra.gmra.mrb[0].mxu0 %vm594_vm0, %v960_v8  ;;  %878 = vmatmul.mubr.msk.bf16.vlgmr.msra.gmra.mrb[0].mxu1 %vm594_vm0, %v961_v52 }
  0xef   : > { %649 = vmatprep.mubr.bf16.mxu0 %v1108_v10  ;;  %669 = vmatprep.mubr.bf16.mxu1 %v1108_v10 }
  0xf6   : > { %877 = vmatmul.mubr.msk.bf16.gmra.mrb[4].mxu0 %vm594_vm0, %v962_v49  ;;  %879 = vmatmul.mubr.msk.bf16.gmra.mrb[4].mxu1 %vm594_vm0, %v963_v5 }
 0x1c1   : > { %v1383_v0 = vpop.f32.mrb[0].mxu0  ;;  %v661_v23 = vpop.f32.mrb[0].mxu1 }
 0x1c2   : > { %v662_v24 = vadd.f32 %v661_v23, %v557_v16  ;;  %v1385_v25 = vpop.f32.mrb[1].mxu0  ;;  %v663_v26 = vpop.f32.mrb[1].mxu1  ;;  %v642_v18 = vadd.f32 %v1383_v0, %v537_v17 }
 0x1c3   : > { %v664_v10 = vadd.f32 %v663_v26, %v557_v16  ;;  %v1387_v27 = vpop.f32.mrb[2].mxu0  ;;  %v665_v28 = vpop.f32.mrb[2].mxu1  ;;  %v644_v21 = vadd.f32 %v1385_v25, %v537_v17 }
 0x1c4   : > { %v880_v29 = vmul.f32 -1.442695, %v662_v24  ;;  %v666_v30 = vadd.f32 %v665_v28, %v562_v14  ;;  %v1389_v31 = vpop.f32.mrb[3].mxu0  ;;  %v667_v32 = vpop.f32.mrb[3].mxu1  ;;  %v646_v36 = vadd.f32 %v1387_v27, %v542_v63 }
 0x1c5   : > { %v881_v33 = vmul.f32 -1.442695, %v664_v10  ;;  %v668_v34 = vadd.f32 %v667_v32, %v562_v14  ;;  %v648_v49 = vadd.f32 %v1389_v31, %v542_v63  ;;  %v547_v0 = vpop.permute.xlu0 %546  ;;  %v552_v25 = vpop.permute.xlu1 %551 }
 0x1c6   : > { %996 = vpow2.f32 %v880_v29  ;;  %v882_v35 = vmul.f32 -1.442695, %v666_v30 }
 0x1c7   : > { %998 = vpow2.f32 %v881_v33  ;;  %v883_v40 = vmul.f32 -1.442695, %v668_v34 }
 0x1c8   : > { %1000 = vpow2.f32 %v882_v35 }
 0x1c9   : > { %1002 = vpow2.f32 %v883_v40  ;;  %v1391_v43 = vpop.f32.mrb[4].mxu0  ;;  %v671_v44 = vpop.f32.mrb[4].mxu1 }
 0x1ca   : > { %v672_v45 = vadd.f32 %v671_v44, %v567_v42  ;;  %v1393_v46 = vpop.f32.mrb[5].mxu0  ;;  %v673_v47 = vpop.f32.mrb[5].mxu1  ;;  %v652_v23 = vadd.f32 %v1391_v43, %v547_v0 }
 0x1cb   : > { %v674_v48 = vadd.f32 %v673_v47, %v567_v42  ;;  %v1395_v50 = vpop.f32.mrb[6].mxu0  ;;  %v675_v51 = vpop.f32.mrb[6].mxu1  ;;  %v654_v26 = vadd.f32 %v1393_v46, %v547_v0 }
 0x1cc   : > { %v884_v53 = vmul.f32 -1.442695, %v672_v45  ;;  %v676_v54 = vadd.f32 %v675_v51, %v572_v41  ;;  %v1397_v55 = vpop.f32.mrb[7].mxu0  ;;  %v677_v56 = vpop.f32.mrb[7].mxu1  ;;  %v656_v28 = vadd.f32 %v1395_v50, %v552_v25 }
 0x1cd   : > { %v885_v58 = vmul.f32 -1.442695, %v674_v48  ;;  %v678_v59 = vadd.f32 %v677_v56, %v572_v41  ;;  %v658_v31 = vadd.f32 %v1397_v55, %v552_v25 }
 0x1ce   : > { %1004 = vpow2.f32 %v884_v53  ;;  %v886_v60 = vmul.f32 -1.442695, %v676_v54 }
 0x1cf   : > { %1006 = vpow2.f32 %v885_v58  ;;  %v887_v1 = vmul.f32 -1.442695, %v678_v59 }
 0x1d0   : > { %v997_v37 = vpop.eup %996  ;;  %1008 = vpow2.f32 %v886_v60 }
 0x1d1   : > { %v999_v2 = vpop.eup %998  ;;  %v704_v3 = vadd.f32 1.0, %v997_v37  ;;  %1010 = vpow2.f32 %v887_v1 }
 0x1d2   : > { %v1001_v4 = vpop.eup %1000  ;;  %v705_v38 = vadd.f32 1.0, %v999_v2 }
 0x1d3   : > { %v1003_v6 = vpop.eup %1002  ;;  %1012 = vrcp.f32 %v704_v3  ;;  %v706_v7 = vadd.f32 1.0, %v1001_v4 }
 0x1d4   : > { %1014 = vrcp.f32 %v705_v38  ;;  %v707_v39 = vadd.f32 1.0, %v1003_v6 }
 0x1d5   : > { %1016 = vrcp.f32 %v706_v7 }
 0x1d6   : > { %1018 = vrcp.f32 %v707_v39 }
 0x1d8   : > { %v1005_v9 = vpop.eup %1004 }
 0x1d9   : > { %v1007_v11 = vpop.eup %1006  ;;  %v708_v12 = vadd.f32 1.0, %v1005_v9 }
 0x1da   : > { %v1009_v13 = vpop.eup %1008  ;;  %v709_v61 = vadd.f32 1.0, %v1007_v11 }
 0x1db   : > { %v1011_v15 = vpop.eup %1010  ;;  %1020 = vrcp.f32 %v708_v12  ;;  %v710_v62 = vadd.f32 1.0, %v1009_v13 }
 0x1dc   : > { %1022 = vrcp.f32 %v709_v61  ;;  %v711_v19 = vadd.f32 1.0, %v1011_v15 }
 0x1dd   : > { %v1013_v20 = vpop.eup %1012  ;;  %1024 = vrcp.f32 %v710_v62 }
 0x1de   : > { %v1015_v22 = vpop.eup %1014  ;;  %v728_v57 = vmul.f32 %v1013_v20, %v642_v18  ;;  %1026 = vrcp.f32 %v711_v19 }
 0x1df   : > { %v1017_v8 = vpop.eup %1016  ;;  %v729_v52 = vmul.f32 %v1015_v22, %v644_v21 }
 0x1e0   : > { %v1019_v5 = vpop.eup %1018  ;;  %736 = vst [vmem:[%s300_s10] sm:$0xff] %v728_v57  ;;  %v730_v14 = vmul.f32 %v1017_v8, %v646_v36 }
 0x1e1   : > { %737 = vst [vmem:[%s300_s10 + $0x8] sm:$0xff] %v729_v52  ;;  %v731_v16 = vmul.f32 %v1019_v5, %v648_v49 }
 0x1e2   : > { %738 = vst [vmem:[%s300_s10 + $0x10] sm:$0xff] %v730_v14 }
 0x1e3   : > { %739 = vst [vmem:[%s300_s10 + $0x18] sm:$0xff] %v731_v16 }
 0x1e5   : > { %v1021_v24 = vpop.eup %1020 }
 0x1e6   : > { %v1023_v10 = vpop.eup %1022  ;;  %v732_v27 = vmul.f32 %v1021_v24, %v652_v23 }
 0x1e7   : > { %v1025_v29 = vpop.eup %1024  ;;  %v733_v30 = vmul.f32 %v1023_v10, %v654_v26 }
 0x1e8   : > { %v1027_v32 = vpop.eup %1026  ;;  %740 = vst [vmem:[%s300_s10 + $0x20] sm:$0xff] %v732_v27  ;;  %v734_v33 = vmul.f32 %v1025_v29, %v656_v28 }
 0x1e9   : > { %741 = vst [vmem:[%s300_s10 + $0x28] sm:$0xff] %v733_v30  ;;  %v735_v34 = vmul.f32 %v1027_v32, %v658_v31 }
 0x1ea   : > { %742 = vst [vmem:[%s300_s10 + $0x30] sm:$0xff] %v734_v33 }
 0x1eb   : > { %743 = vst [vmem:[%s300_s10 + $0x38] sm:$0xff] %v735_v34 }
 0x1ec   : > { %1041 = shalt.err (!%p1038_p8)
}
 0x1ed   : > { %s1042_s9 = scalar_lea.hbm %s1412_s15, 1024  ;;  %s1046_s7 = scalar_lea.hbm %s1470_s5, 2048 }
 0x1ee   : > { %p1043_p11 = scmp.ne.s32.totalorder %s1412_s15, %s1042_s9  ;;  %p1047_p0 = scmp.lt.u32.totalorder %s1412_s15, %s1470_s5 }
 0x1ef   : > { %p1048_p1 = scmp.lt.u32.totalorder %s1046_s7, %s1042_s9  ;;  %p1050_p3 = scmp.lt.u32.totalorder %s1042_s9, %s1412_s15 }
 0x1f0   : > { %p1044_p12 = pnand %p1043_p11, %p1181_p5 }
 0x1f1   : > { %p1049_p2 = por %p1048_p1, %p1047_p0 }
 0x1f2   : > { %p1045_p13 = pneg %p1044_p12 }
 0x1f3   : > { %p1051_p4 = por %p1050_p3, %p1049_p2 }
 0x1f5   : > { %p1052_p6 = pnand %p1051_p4, %p1045_p13 }
 0x1f7   : > { %1055 = shalt.err (!%p1052_p6)
}
 0x1f8   : > { %s1110_s12 = smov 256   ;;  %s1111_s11 = smov 16  }
 0x1f9   : > { %900 = dma.vmem_to_hbm [thread:$0]  (%p1181_p5), %s1414_s13, 1024, %s1412_s15, %s1418_s21, %s1110_s12, %s1110_s12, %s1111_s11  }
 0x1fa PF: > { %s775_s14 = sand.u32 1, %s1086_s18   ;;  %p903_p7 = pnand %p863_p10, %p1192_p9 }
 0x1fb   : > { %s776_s16 = scalar_lea.sflag [#allocation4], %s775_s14 }
 0x1fc   : > { %1081 = dma.done.wait (!%p903_p7), %s776_s16, 1024  }
 0x1fd   : > { %1083 = vsyncadd (!%p903_p7), %s776_s16, 4294966272  ;;  %s18_s23 = sadd.s32 1, %s1106_s23   ;;  %s1473_s18 = smov %s1090_s19 }
 0x1fe   : > { %p15_p8 = scmp.ge.s32.totalorder %s18_s23, 4   ;;  %s1474_s19 = smov %s1094_s20 }
 0x1ff   : > { %s1475_s20 = smov %s1190_s30  ;;  %s1476_s21 = smov %s1102_s22 }
 0x200   : > { %s1477_s22 = smov %s1479_s26  ;;  %17 = sbr.rel (!%p15_p8) target bundleno = 4 (0x4), region = 106 }
 0x207   :  { %781 = vsyncpa [#allocation4], 1 }
 0x208   :  { %783 = vsyncpa [#allocation4 + $0x1], 1 }

</bundles_post_ra>
